<compile_context>
chip_gen: v5e
topology: v5e:2x2
jax: 0.10.0
libtpu: 0.0.40
codegen_flags: <defaults>
</compile_context>

<pallas_src>
import functools

import jax
import jax.numpy as jnp
from jax import lax
from jax.experimental import pallas as pl
from jax.experimental.pallas import tpu as pltpu


_MASK_VALUE = -1e30


def ipam_kernel(x_ref, wq_ref, bq_ref, wk_ref, bk_ref, wv_ref, bv_ref,
                gamma_ref,               # inputs
                o_ref,                   # output
                k_s, v_s, gate_s,        # VMEM scratch
                *, n_real):
    qi = pl.program_id(1)
    tq = o_ref.shape[2]
    n_pad = k_s.shape[1]

    # ---- once per batch element: key / value projections -> scratch --------
    # (no (F, N) fused temporary; results land directly in k_s / v_s)
    @pl.when(qi == 0)
    def _():
        x_full = x_ref[0]                                        # (C, N_pad)
        k_s[...] = lax.dot_general(
            wk_ref[...], x_full,
            dimension_numbers=(((1,), (0,)), ((), ())),
            preferred_element_type=jnp.float32) + bk_ref[...]
        v_s[...] = (lax.dot_general(
            wv_ref[...], x_full,
            dimension_numbers=(((1,), (0,)), ((), ())),
            preferred_element_type=jnp.float32) + bv_ref[...]).astype(v_s.dtype)

    # ---- per-tile query projection (q scratch dropped) ----------------------
    col = pl.multiple_of(qi * tq, tq)
    x_tile = x_ref[0, :, pl.ds(col, tq)]                         # (C, TQ)
    q_ct = lax.dot_general(
        wq_ref[...], x_tile,
        dimension_numbers=(((1,), (0,)), ((), ())),
        preferred_element_type=jnp.float32) + bq_ref[...]        # (C8, TQ) f32

    # energy[i, j] = sum_c q[c, i] * k[c, j]   (LHS is tiny: C8 x TQ)
    energy = lax.dot_general(
        q_ct, k_s[...],
        dimension_numbers=(((0,), (0,)), ((), ())),
        preferred_element_type=jnp.float32)                      # (TQ, N_pad)

    if n_pad != n_real:                                          # static branch
        col_ids = lax.broadcasted_iota(jnp.int32, energy.shape, 1)
        energy = jnp.where(col_ids < n_real, energy, _MASK_VALUE)

    # ---- softmax stats + >0.5 gate (one survivor per row, iff l < 2) --------
    m = jnp.max(energy, axis=-1, keepdims=True)                  # (TQ, 1)
    l = jnp.sum(jnp.exp(energy - m), axis=-1, keepdims=True)     # (TQ, 1), >= 1

    # scalar "does any row pass?" flag via a (1,1) VMEM round trip
    gate_s[...] = jnp.min(l, axis=0, keepdims=True)
    l_min = gate_s[0, 0]

    x_res = x_tile.astype(jnp.float32)                           # residual

    @pl.when(l_min < 2.0)                  # at least one row passes the gate
    def _():
        row_scale = jnp.where(l < 2.0, pl.reciprocal(l, approx=True), 0.0)
        att = jnp.where(energy >= m, row_scale, 0.0)             # (TQ, N_pad)
        # out[c, i] = sum_j v[c, j] * att[i, j]   (bf16 operands, f32 acc)
        out_ct = lax.dot_general(
            v_s[...], att.astype(v_s.dtype),
            dimension_numbers=(((1,), (1,)), ((), ())),
            preferred_element_type=jnp.float32)                  # (C, TQ)
        o_ref[0] = (gamma_ref[0] * out_ct + x_res).astype(o_ref.dtype)

    @pl.when(l_min >= 2.0)                 # no row passes: residual only
    def _():
        o_ref[0] = x_res.astype(o_ref.dtype)


def _pick_vmem_limit_bytes():
    """Generation-aware VMEM limit (3/4 of physical, capped), safe fallback."""
    try:
        info = pltpu.get_tpu_info()
        cap = int(getattr(info, "vmem_capacity_bytes", 0))
        if cap > 0:
            return int(min(cap * 3 // 4, 100 * 1024 * 1024))
    except Exception:
        pass
    return 48 * 1024 * 1024          # fits v5e / v6e / v7x physical VMEM


def _pick_tq(n_pad, c, c8, x_bytes, v_bytes, vmem_limit, tq_max):
    """Largest query tile (multiple of 128, divides n_pad) under the budget."""
    best = 128
    cand = 128
    while cand <= min(tq_max, n_pad):
        if n_pad % cand == 0:
            est = (2 * c * n_pad * x_bytes            # x block (double-buffered)
                   + c8 * n_pad * 4                   # k scratch (f32)
                   + c * n_pad * v_bytes              # v scratch
                   + 2 * cand * n_pad * 4             # energy strip + exp temp
                   + 2 * c * cand * 4                 # out block (double-buffered)
                   + 2 * (2 * c8 + c) * c * x_bytes)  # projection weights
            if est <= (vmem_limit * 7) // 10:
                best = cand
        cand += 128
    return best


def ipam_forward(x_nchw, wq, bq, wk, bk, wv, bv, gamma, *,
                 tq_max=512, x_dtype=jnp.float32, value_dtype=jnp.bfloat16):
    """IPAM forward.

    x_nchw : (B, C, H, W) float32
    wq, wk : (C, C//8), wv : (C, C)  -- 1x1 conv weights stored (C_in, C_out)
    bq, bk : (C//8,), bv : (C,), gamma : (1,)
    x_dtype=bfloat16 halves the resident x slab (v7x VMEM mode) at a small,
    documented precision cost.
    """
    B, C, H, W = x_nchw.shape
    N = H * W
    C8 = wq.shape[1]

    n_pad = ((N + 127) // 128) * 128
    vmem_limit = _pick_vmem_limit_bytes()
    x_bytes = jnp.dtype(x_dtype).itemsize
    v_bytes = jnp.dtype(value_dtype).itemsize
    tq = _pick_tq(n_pad, C, C8, x_bytes, v_bytes, vmem_limit, tq_max)
    nq = n_pad // tq

    # Free reshape: stays channels-major / N-minor (no HBM transpose).
    x_cn = x_nchw.reshape(B, C, N)
    if n_pad != N:
        x_cn = jnp.pad(x_cn, ((0, 0), (0, 0), (0, n_pad - N)))
    x_cn = x_cn.astype(x_dtype)

    wq_t = wq.T.astype(x_dtype)                      # (C8, C)
    wk_t = wk.T.astype(x_dtype)                      # (C8, C)
    wv_t = wv.T.astype(x_dtype)                      # (C,  C)
    bq2 = bq.reshape(C8, 1).astype(jnp.float32)
    bk2 = bk.reshape(C8, 1).astype(jnp.float32)
    bv2 = bv.reshape(C, 1).astype(jnp.float32)
    gamma_s = jnp.asarray(gamma, jnp.float32).reshape(1)

    kernel = functools.partial(ipam_kernel, n_real=N)

    grid_spec = pltpu.PrefetchScalarGridSpec(
        num_scalar_prefetch=0,
        grid=(B, nq),
        in_specs=[
            pl.BlockSpec((1, C, n_pad), lambda b, q: (b, 0, 0)),   # x (reused)
            pl.BlockSpec((C8, C), lambda b, q: (0, 0)),            # wq^T
            pl.BlockSpec((C8, 1), lambda b, q: (0, 0)),            # bq
            pl.BlockSpec((C8, C), lambda b, q: (0, 0)),            # wk^T
            pl.BlockSpec((C8, 1), lambda b, q: (0, 0)),            # bk
            pl.BlockSpec((C, C), lambda b, q: (0, 0)),             # wv^T
            pl.BlockSpec((C, 1), lambda b, q: (0, 0)),             # bv
            pl.BlockSpec(memory_space=pltpu.MemorySpace.SMEM),     # gamma
        ],
        out_specs=pl.BlockSpec((1, C, tq), lambda b, q: (b, 0, q)),
        scratch_shapes=[
            pltpu.VMEM((C8, n_pad), jnp.float32),    # k (f32: exact gate math)
            pltpu.VMEM((C, n_pad), value_dtype),     # v (bf16: MXU-native)
            pltpu.VMEM((1, 1), jnp.float32),         # tile-skip gate scalar
        ],
    )

    out_cn = pl.pallas_call(
        kernel,
        out_shape=jax.ShapeDtypeStruct((B, C, n_pad), jnp.float32),
        grid_spec=grid_spec,
        compiler_params=pltpu.CompilerParams(
            dimension_semantics=("parallel", "arbitrary"),
            vmem_limit_bytes=vmem_limit,
        ),
    )(x_cn, wq_t, bq2, wk_t, bk2, wv_t, bv2, gamma_s)

    if n_pad != N:
        out_cn = out_cn[:, :, :N]
    return out_cn.reshape(B, C, H, W)


def ipam_reference(x_nchw, wq, bq, wk, bk, wv, bv, gamma):
    """Pure-JAX reference mirroring the PyTorch forward (plus the softmax
    attention, used by the test to locate gate-boundary rows)."""
    B, C, H, W = x_nchw.shape
    N = H * W
    hp = jax.lax.Precision.HIGHEST
    x = x_nchw.reshape(B, C, N)                                        # (B, C, N)
    q = jnp.einsum('co,bcn->bon', wq, x, precision=hp) + bq[:, None]   # (B, C8, N)
    k = jnp.einsum('co,bcn->bon', wk, x, precision=hp) + bk[:, None]
    v = jnp.einsum('co,bcn->bon', wv, x, precision=hp) + bv[:, None]   # (B, C, N)
    energy = jnp.einsum('bci,bcj->bij', q, k, precision=hp)            # (B, N, N)
    att_soft = jax.nn.softmax(energy, axis=-1)
    att = jnp.where(att_soft > 0.5, att_soft, 0.0)
    out = jnp.einsum('bcj,bij->bci', v, att, precision=hp)             # (B, C, N)
    out = gamma[0] * out + x
    return out.reshape(B, C, H, W), att_soft


def check_against_reference(out, ref_out, att_soft, *, lo, hi, atol, rtol,
                            min_decisive=0.5, name=""):
    # The >0.5 gate is discontinuous: rows whose softmax peak lies near the
    # gate can legitimately land on either side under tiny rounding
    # differences, so verify strictly only on decisively-gated rows.
    B, C, H, W = ref_out.shape
    N = H * W
    att_max = jnp.max(att_soft, axis=-1)                        # (B, N)
    decisive = (att_max <= lo) | (att_max >= hi)                # (B, N)
    err = jnp.abs(out - ref_out).reshape(B, C, N)
    tol = atol + rtol * jnp.abs(ref_out).reshape(B, C, N)
    ok = (err <= tol) | (~decisive)[:, None, :]
    frac = float(jnp.mean(decisive))
    assert frac > min_decisive, f"[{name}] degenerate test: only {frac:.2f} decisive rows"
    max_err = float(jnp.max(jnp.where((~decisive)[:, None, :], 0.0, err)))
    assert bool(jnp.all(ok)), f"[{name}] mismatch on decisive rows (max err {max_err:.3e})"


if __name__ == "__main__":
    key = jax.random.PRNGKey(0)
    B, C, H, W = 2, 16, 16, 16       # N = 256, C//8 = 2
    C8 = C // 8

    keys = jax.random.split(key, 8)
    x = jax.random.normal(keys[0], (B, C, H, W), dtype=jnp.float32)
    # Unit-scale q/k weights give a strongly peaked softmax so the >0.5 gate
    # actually passes attention for most rows.
    wq = jax.random.normal(keys[1], (C, C8), dtype=jnp.float32)
    bq = jax.random.normal(keys[2], (C8,), dtype=jnp.float32) * 0.1
    wk = jax.random.normal(keys[3], (C, C8), dtype=jnp.float32)
    bk = jax.random.normal(keys[4], (C8,), dtype=jnp.float32) * 0.1
    wv = jax.random.normal(keys[5], (C, C), dtype=jnp.float32) * 0.25
    bv = jax.random.normal(keys[6], (C,), dtype=jnp.float32) * 0.1
    # gamma is nn.Parameter(torch.zeros(1)) at init; use a nonzero value so
    # the attention path contributes to the output.
    gamma = jnp.full((1,), 0.5, dtype=jnp.float32)

    # ---- case 1: default f32 path, N a multiple of 128 ----------------------
    out = jax.block_until_ready(ipam_forward(x, wq, bq, wk, bk, wv, bv, gamma))
    ref_out, att_soft = ipam_reference(x, wq, bq, wk, bk, wv, bv, gamma)
    assert out.shape == ref_out.shape == (B, C, H, W)
    check_against_reference(out, ref_out, att_soft, lo=0.4, hi=0.95,
                            atol=5e-2, rtol=5e-2, name="f32")

    # ---- case 2: padded path (N = 100 not a multiple of 128) ----------------
    Hp, Wp = 10, 10
    xp = jax.random.normal(keys[7], (1, C, Hp, Wp), dtype=jnp.float32)
    out_p = jax.block_until_ready(ipam_forward(xp, wq, bq, wk, bk, wv, bv, gamma))
    ref_p, att_p = ipam_reference(xp, wq, bq, wk, bk, wv, bv, gamma)
    assert out_p.shape == ref_p.shape == (1, C, Hp, Wp)
    check_against_reference(out_p, ref_p, att_p, lo=0.4, hi=0.95,
                            atol=5e-2, rtol=5e-2, name="padded")

    # ---- case 3: bf16-x VMEM-saving mode (v7x) — loose consistency check ----
    out_bf16 = jax.block_until_ready(
        ipam_forward(x, wq, bq, wk, bk, wv, bv, gamma, x_dtype=jnp.bfloat16))
    assert out_bf16.shape == out.shape
    assert bool(jnp.all(jnp.isfinite(out_bf16))), "bf16-x path produced non-finite values"
    diff = jnp.abs(out_bf16 - out)
    tol_b = 2e-1 + 1e-1 * jnp.abs(out)
    frac_bad = float(jnp.mean(diff > tol_b))
    # allow a tiny fraction of elements to differ (gate-boundary rows may flip
    # under bf16 rounding; this is a documented precision trade-off)
    assert frac_bad < 0.02, f"bf16-x path deviates too much from f32 path ({frac_bad:.4f})"

    print("KERNEL_OK")
</pallas_src>

<mosaic_0001>
module attributes {stable_mosaic.version = 11 : i64} {
  func.func @ipam_kernel(%arg0: i32, %arg1: i32, %arg2: memref<1x16x256xf32, #tpu.memory_space<vmem>>, %arg3: memref<2x16xf32, #tpu.memory_space<vmem>>, %arg4: memref<2x1xf32, #tpu.memory_space<vmem>>, %arg5: memref<2x16xf32, #tpu.memory_space<vmem>>, %arg6: memref<2x1xf32, #tpu.memory_space<vmem>>, %arg7: memref<16x16xf32, #tpu.memory_space<vmem>>, %arg8: memref<16x1xf32, #tpu.memory_space<vmem>>, %arg9: memref<1xf32, #tpu.memory_space<smem>>, %arg10: memref<1x16x256xf32, #tpu.memory_space<vmem>>, %arg11: memref<2x256xf32, #tpu.memory_space<vmem>>, %arg12: memref<16x256xbf16, #tpu.memory_space<vmem>>, %arg13: memref<1x1xf32, #tpu.memory_space<vmem>>) attributes {dimension_semantics = [#tpu.dimension_semantics<parallel>, #tpu.dimension_semantics<arbitrary>], iteration_bounds = array<i64: 2, 1>, scalar_prefetch = 0 : i64, scratch_operands = 3 : i64, tpu.core_type = #tpu.core_type<tc>, window_params = [{transform_indices = @transform_0, window_bounds = array<i64: 1, 16, 256>}, {pipeline_mode = #tpu.pipeline_mode<synchronous>, transform_indices = @transform_1, window_bounds = array<i64: 2, 16>}, {pipeline_mode = #tpu.pipeline_mode<synchronous>, transform_indices = @transform_2, window_bounds = array<i64: 2, 1>}, {pipeline_mode = #tpu.pipeline_mode<synchronous>, transform_indices = @transform_3, window_bounds = array<i64: 2, 16>}, {pipeline_mode = #tpu.pipeline_mode<synchronous>, transform_indices = @transform_4, window_bounds = array<i64: 2, 1>}, {pipeline_mode = #tpu.pipeline_mode<synchronous>, transform_indices = @transform_5, window_bounds = array<i64: 16, 16>}, {pipeline_mode = #tpu.pipeline_mode<synchronous>, transform_indices = @transform_6, window_bounds = array<i64: 16, 1>}, {transform_indices = @transform_7, window_bounds = array<i64: 1>}, {transform_indices = @transform_8, window_bounds = array<i64: 1, 16, 256>}]} {
    %c0_i32 = arith.constant 0 : i32
    %0 = arith.cmpi eq, %arg1, %c0_i32 : i32
    %1 = arith.extui %0 : i1 to i32
    %c0_i32_0 = arith.constant 0 : i32
    %2 = arith.cmpi ne, %1, %c0_i32_0 : i32
    scf.if %2 {
      %c0_20 = arith.constant 0 : index
      %c0_21 = arith.constant 0 : index
      %c0_22 = arith.constant 0 : index
      %33 = vector.load %arg2[%c0_20, %c0_21, %c0_22] : memref<1x16x256xf32, #tpu.memory_space<vmem>>, vector<1x16x256xf32>
      %34 = vector.shape_cast %33 : vector<1x16x256xf32> to vector<16x256xf32>
      %c0_23 = arith.constant 0 : index
      %c0_24 = arith.constant 0 : index
      %35 = vector.load %arg5[%c0_23, %c0_24] : memref<2x16xf32, #tpu.memory_space<vmem>>, vector<2x16xf32>
      %cst_25 = arith.constant dense<0.000000e+00> : vector<2x256xf32>
      %36 = tpu.matmul %35, %34, %cst_25 {dimension_numbers = #tpu.dot_dimension_numbers<[1], [0], [0], [1], [0, 0, 1, 1], [], []>} : vector<2x16xf32>, vector<16x256xf32>, vector<2x256xf32> -> vector<2x256xf32>
      %c0_26 = arith.constant 0 : index
      %c0_27 = arith.constant 0 : index
      %37 = vector.load %arg6[%c0_26, %c0_27] : memref<2x1xf32, #tpu.memory_space<vmem>>, vector<2x1xf32>
      %38 = vector.broadcast %37 : vector<2x1xf32> to vector<2x256xf32>
      %39 = arith.addf %36, %38 : vector<2x256xf32>
      %c0_28 = arith.constant 0 : index
      %c0_29 = arith.constant 0 : index
      %40 = vector.load %arg11[%c0_28, %c0_29] : memref<2x256xf32, #tpu.memory_space<vmem>>, vector<2x256xf32>
      tpu.vector_store %arg11[%c0_28, %c0_29], %39 {strides = array<i32>} : memref<2x256xf32, #tpu.memory_space<vmem>>, vector<2x256xf32>,
      %c0_30 = arith.constant 0 : index
      %c0_31 = arith.constant 0 : index
      %41 = vector.load %arg7[%c0_30, %c0_31] : memref<16x16xf32, #tpu.memory_space<vmem>>, vector<16x16xf32>
      %cst_32 = arith.constant dense<0.000000e+00> : vector<16x256xf32>
      %42 = tpu.matmul %41, %34, %cst_32 {dimension_numbers = #tpu.dot_dimension_numbers<[1], [0], [0], [1], [0, 0, 1, 1], [], []>} : vector<16x16xf32>, vector<16x256xf32>, vector<16x256xf32> -> vector<16x256xf32>
      %c0_33 = arith.constant 0 : index
      %c0_34 = arith.constant 0 : index
      %43 = vector.load %arg8[%c0_33, %c0_34] : memref<16x1xf32, #tpu.memory_space<vmem>>, vector<16x1xf32>
      %44 = vector.broadcast %43 : vector<16x1xf32> to vector<16x256xf32>
      %45 = arith.addf %42, %44 : vector<16x256xf32>
      %46 = arith.truncf %45 : vector<16x256xf32> to vector<16x256xbf16>
      %c0_35 = arith.constant 0 : index
      %c0_36 = arith.constant 0 : index
      %47 = vector.load %arg12[%c0_35, %c0_36] : memref<16x256xbf16, #tpu.memory_space<vmem>>, vector<16x256xbf16>
      tpu.vector_store %arg12[%c0_35, %c0_36], %46 {strides = array<i32>} : memref<16x256xbf16, #tpu.memory_space<vmem>>, vector<16x256xbf16>,
    } else {
    }
    %c256_i32 = arith.constant 256 : i32
    %3 = arith.muli %arg1, %c256_i32 : i32
    %4 = tpu.assume_multiple %3, 256 : i32
    %c0 = arith.constant 0 : index
    %c0_1 = arith.constant 0 : index
    %5 = arith.index_cast %4 : i32 to index
    %6 = vector.load %arg2[%c0, %c0_1, %5] : memref<1x16x256xf32, #tpu.memory_space<vmem>>, vector<1x16x256xf32>
    %7 = vector.shape_cast %6 : vector<1x16x256xf32> to vector<16x256xf32>
    %c0_2 = arith.constant 0 : index
    %c0_3 = arith.constant 0 : index
    %8 = vector.load %arg3[%c0_2, %c0_3] : memref<2x16xf32, #tpu.memory_space<vmem>>, vector<2x16xf32>
    %cst = arith.constant dense<0.000000e+00> : vector<2x256xf32>
    %9 = tpu.matmul %8, %7, %cst {dimension_numbers = #tpu.dot_dimension_numbers<[1], [0], [0], [1], [0, 0, 1, 1], [], []>} : vector<2x16xf32>, vector<16x256xf32>, vector<2x256xf32> -> vector<2x256xf32>
    %c0_4 = arith.constant 0 : index
    %c0_5 = arith.constant 0 : index
    %10 = vector.load %arg4[%c0_4, %c0_5] : memref<2x1xf32, #tpu.memory_space<vmem>>, vector<2x1xf32>
    %11 = vector.broadcast %10 : vector<2x1xf32> to vector<2x256xf32>
    %12 = arith.addf %9, %11 : vector<2x256xf32>
    %c0_6 = arith.constant 0 : index
    %c0_7 = arith.constant 0 : index
    %13 = vector.load %arg11[%c0_6, %c0_7] : memref<2x256xf32, #tpu.memory_space<vmem>>, vector<2x256xf32>
    %cst_8 = arith.constant dense<0.000000e+00> : vector<256x256xf32>
    %14 = tpu.matmul %12, %13, %cst_8 {dimension_numbers = #tpu.dot_dimension_numbers<[0], [0], [1], [1], [0, 1, 1, 1], [], []>} : vector<2x256xf32>, vector<2x256xf32>, vector<256x256xf32> -> vector<256x256xf32>
    %cst_9 = arith.constant dense<0xFF800000> : vector<256xf32>
    %15 = vector.multi_reduction <maximumf>, %14, %cst_9 [1] : vector<256x256xf32> to vector<256xf32>
    %16 = vector.shape_cast %15 : vector<256xf32> to vector<256x1xf32>
    %17 = vector.broadcast %16 : vector<256x1xf32> to vector<256x256xf32>
    %18 = arith.subf %14, %17 : vector<256x256xf32>
    %19 = math.exp %18 : vector<256x256xf32>
    %cst_10 = arith.constant dense<0.000000e+00> : vector<256xf32>
    %20 = vector.multi_reduction <add>, %19, %cst_10 [1] : vector<256x256xf32> to vector<256xf32>
    %21 = vector.shape_cast %20 : vector<256xf32> to vector<256x1xf32>
    %cst_11 = arith.constant dense<0x7F800000> : vector<1xf32>
    %22 = vector.multi_reduction <minimumf>, %21, %cst_11 [0] : vector<256x1xf32> to vector<1xf32>
    %23 = vector.shape_cast %22 : vector<1xf32> to vector<1x1xf32>
    %c0_12 = arith.constant 0 : index
    %c0_13 = arith.constant 0 : index
    %24 = vector.load %arg13[%c0_12, %c0_13] : memref<1x1xf32, #tpu.memory_space<vmem>>, vector<1x1xf32>
    tpu.vector_store %arg13[%c0_12, %c0_13], %23 {strides = array<i32>} : memref<1x1xf32, #tpu.memory_space<vmem>>, vector<1x1xf32>,
    %c0_14 = arith.constant 0 : index
    %c0_15 = arith.constant 0 : index
    %25 = vector.load %arg13[%c0_14, %c0_15] : memref<1x1xf32, #tpu.memory_space<vmem>>, vector<1x1xf32>
    %26 = vector.extract %25[0, 0] : f32 from vector<1x1xf32>
    %cst_16 = arith.constant 2.000000e+00 : f32
    %27 = arith.cmpf olt, %26, %cst_16 : f32
    %28 = arith.extui %27 : i1 to i32
    %c0_i32_17 = arith.constant 0 : i32
    %29 = arith.cmpi ne, %28, %c0_i32_17 : i32
    scf.if %29 {
      %cst_20 = arith.constant 2.000000e+00 : f32
      %33 = vector.broadcast %cst_20 : f32 to vector<256x1xf32>
      %34 = arith.cmpf olt, %21, %33 : vector<256x1xf32>
      %35 = tpu.reciprocal %21 {approx = true} : vector<256x1xf32> -> vector<256x1xf32>
      %cst_21 = arith.constant 0.000000e+00 : f32
      %36 = vector.broadcast %cst_21 : f32 to vector<256x1xf32>
      %37 = arith.select %34, %35, %36 : vector<256x1xi1>, vector<256x1xf32>
      %38 = vector.broadcast %16 : vector<256x1xf32> to vector<256x256xf32>
      %39 = arith.cmpf oge, %14, %38 : vector<256x256xf32>
      %cst_22 = arith.constant 0.000000e+00 : f32
      %40 = vector.shape_cast %37 : vector<256x1xf32> to vector<256x1xf32>
      %41 = vector.broadcast %40 : vector<256x1xf32> to vector<256x256xf32>
      %42 = vector.broadcast %cst_22 : f32 to vector<256x256xf32>
      %43 = arith.select %39, %41, %42 : vector<256x256xi1>, vector<256x256xf32>
      %c0_23 = arith.constant 0 : index
      %c0_24 = arith.constant 0 : index
      %44 = vector.load %arg12[%c0_23, %c0_24] : memref<16x256xbf16, #tpu.memory_space<vmem>>, vector<16x256xbf16>
      %45 = arith.truncf %43 : vector<256x256xf32> to vector<256x256xbf16>
      %cst_25 = arith.constant dense<0.000000e+00> : vector<16x256xf32>
      %46 = tpu.matmul %44, %45, %cst_25 {dimension_numbers = #tpu.dot_dimension_numbers<[1], [1], [0], [0], [0, 0, 1, 0], [], []>} : vector<16x256xbf16>, vector<256x256xbf16>, vector<16x256xf32> -> vector<16x256xf32>
      %c0_26 = arith.constant 0 : index
      %47 = memref.load %arg9[%c0_26] : memref<1xf32, #tpu.memory_space<smem>>
      %48 = vector.broadcast %47 : f32 to vector<16x256xf32>
      %49 = arith.mulf %48, %46 : vector<16x256xf32>
      %50 = arith.addf %49, %7 : vector<16x256xf32>
      %c0_27 = arith.constant 0 : index
      %c0_28 = arith.constant 0 : index
      %c0_29 = arith.constant 0 : index
      %51 = vector.load %arg10[%c0_27, %c0_28, %c0_29] : memref<1x16x256xf32, #tpu.memory_space<vmem>>, vector<1x16x256xf32>
      %52 = vector.shape_cast %51 : vector<1x16x256xf32> to vector<16x256xf32>
      %53 = vector.shape_cast %50 : vector<16x256xf32> to vector<1x16x256xf32>
      tpu.vector_store %arg10[%c0_27, %c0_28, %c0_29], %53 {strides = array<i32>} : memref<1x16x256xf32, #tpu.memory_space<vmem>>, vector<1x16x256xf32>,
    } else {
    }
    %cst_18 = arith.constant 2.000000e+00 : f32
    %30 = arith.cmpf oge, %26, %cst_18 : f32
    %31 = arith.extui %30 : i1 to i32
    %c0_i32_19 = arith.constant 0 : i32
    %32 = arith.cmpi ne, %31, %c0_i32_19 : i32
    scf.if %32 {
      %c0_20 = arith.constant 0 : index
      %c0_21 = arith.constant 0 : index
      %c0_22 = arith.constant 0 : index
      %33 = vector.load %arg10[%c0_20, %c0_21, %c0_22] : memref<1x16x256xf32, #tpu.memory_space<vmem>>, vector<1x16x256xf32>
      %34 = vector.shape_cast %33 : vector<1x16x256xf32> to vector<16x256xf32>
      %35 = vector.shape_cast %7 : vector<16x256xf32> to vector<1x16x256xf32>
      tpu.vector_store %arg10[%c0_20, %c0_21, %c0_22], %35 {strides = array<i32>} : memref<1x16x256xf32, #tpu.memory_space<vmem>>, vector<1x16x256xf32>,
    } else {
    }
    return
  }
  func.func @transform_0(%arg0: i32, %arg1: i32) -> (i32, i32, i32) {
    %c0_i32 = arith.constant 0 : i32
    %c0_i32_0 = arith.constant 0 : i32
    %c0_i32_1 = arith.constant 0 : i32
    return %arg0, %c0_i32, %c0_i32_0 : i32, i32, i32
  }
  func.func @transform_1(%arg0: i32, %arg1: i32) -> (i32, i32) {
    %c0_i32 = arith.constant 0 : i32
    %c0_i32_0 = arith.constant 0 : i32
    %c0_i32_1 = arith.constant 0 : i32
    return %c0_i32, %c0_i32_0 : i32, i32
  }
  func.func @transform_2(%arg0: i32, %arg1: i32) -> (i32, i32) {
    %c0_i32 = arith.constant 0 : i32
    %c0_i32_0 = arith.constant 0 : i32
    %c0_i32_1 = arith.constant 0 : i32
    return %c0_i32, %c0_i32_0 : i32, i32
  }
  func.func @transform_3(%arg0: i32, %arg1: i32) -> (i32, i32) {
    %c0_i32 = arith.constant 0 : i32
    %c0_i32_0 = arith.constant 0 : i32
    %c0_i32_1 = arith.constant 0 : i32
    return %c0_i32, %c0_i32_0 : i32, i32
  }
  func.func @transform_4(%arg0: i32, %arg1: i32) -> (i32, i32) {
    %c0_i32 = arith.constant 0 : i32
    %c0_i32_0 = arith.constant 0 : i32
    %c0_i32_1 = arith.constant 0 : i32
    return %c0_i32, %c0_i32_0 : i32, i32
  }
  func.func @transform_5(%arg0: i32, %arg1: i32) -> (i32, i32) {
    %c0_i32 = arith.constant 0 : i32
    %c0_i32_0 = arith.constant 0 : i32
    %c0_i32_1 = arith.constant 0 : i32
    return %c0_i32, %c0_i32_0 : i32, i32
  }
  func.func @transform_6(%arg0: i32, %arg1: i32) -> (i32, i32) {
    %c0_i32 = arith.constant 0 : i32
    %c0_i32_0 = arith.constant 0 : i32
    %c0_i32_1 = arith.constant 0 : i32
    return %c0_i32, %c0_i32_0 : i32, i32
  }
  func.func @transform_7(%arg0: i32, %arg1: i32) -> i32 {
    %c0_i32 = arith.constant 0 : i32
    %c0_i32_0 = arith.constant 0 : i32
    return %c0_i32 : i32
  }
  func.func @transform_8(%arg0: i32, %arg1: i32) -> (i32, i32, i32) {
    %c0_i32 = arith.constant 0 : i32
    %c0_i32_0 = arith.constant 0 : i32
    return %arg0, %c0_i32, %arg1 : i32, i32, i32
  }
}

</mosaic_0001>

<bundles_post_ra>
// kernel: tpu_custom_call.1
= control target key start
LH: loop header
LB: loop body
LE: loop exit
PB: predicated region body
PF: predicated region fallthrough
CT: control target
= control target key end

     0   :  { %s3443_s0 = inlined_call_operand.hbm [shape: f32[2,16,256], index: 0, kind: input, shape index: {}]   ;;  %s3444_s1 = inlined_call_operand.vmem [shape: f32[2,16], index: 1, kind: input, shape index: {}]   ;;  %s3445_s2 = inlined_call_operand.vmem [shape: f32[2,1], index: 2, kind: input, shape index: {}]   ;;  %s3446_s3 = inlined_call_operand.vmem [shape: f32[2,16], index: 3, kind: input, shape index: {}]   ;;  %s3447_s4 = inlined_call_operand.vmem [shape: f32[2,1], index: 4, kind: input, shape index: {}]   ;;  %s3448_s5 = inlined_call_operand.vmem [shape: f32[16,16], index: 5, kind: input, shape index: {}]   ;;  %s3449_s6 = inlined_call_operand.vmem [shape: f32[16,1], index: 6, kind: input, shape index: {}]   ;;  %s3450_s7 = inlined_call_operand.<no memory space> [shape: f32[1], index: 7, kind: input, shape index: {}]   ;;  %s3451_s8 = inlined_call_operand.hbm [shape: f32[2,16,256], index: 8, kind: output, shape index: {}]  }
   0x1   :  { %13 = sst [smem:[#allocation5]] %s3450_s7 }
   0x2   :  { %14 = vsyncpa [#allocation7], 0 }
   0x3   :  { %16 = vsyncpa [#allocation7 + $0x1], 0 }
   0x4   :  { %17 = vsyncpa [#allocation8], 0 }
   0x5   :  { %19 = vsyncpa [#allocation8 + $0x1], 0  ;;  %s2444_s29 = smov 0   ;;  %s2446_s30 = smov 0  }
   0x6   :  { %s2448_s9 = smov 0   ;;  %s2450_s10 = smov 0  }
   0x7   :  { %s2452_s11 = smov 0   ;;  %s2454_s12 = smov 0  }
   0x8 LB: > { %3573 = sst [smem:[#allocation12_spill]] %s2385_s11  ;;  %s1814_s7 = sadd.s32 4294967295, %s2389_s12   ;;  %s2389_s12 = sphi %s2454_s12, %s25_s12   ;;  %s2385_s11 = sphi %s2452_s11, %s3780_s11   ;;  %s2381_s10 = sphi %s2450_s10, %s3779_s10   ;;  %s2377_s9 = sphi %s2448_s9, %s3783_s9   ;;  %s2373_s30 = sphi %s2446_s30, %s3782_s30   ;;  %s2369_s29 = sphi %s2444_s29, %s3781_s29  }
   0x9   : > { %s1815_s13 = sadd.s32 4294967294, %s2389_s12   ;;  %s37_s14 = sadd.s32 1, %s2385_s11 }
   0xa   : > { %s44_s15 = sadd.s32 1, %s2377_s9  ;;  %p39_p0 = scmp.ge.s32.totalorder %s37_s14, 2 }
   0xb   : > { %p51_p1 = scmp.ne.s32.totalorder %s2377_s9, %s2373_s30  ;;  %p52_p2 = scmp.eq.s32.totalorder %s2389_s12, 0 }
   0xc   : > { %p57_p3 = scmp.ne.s32.totalorder %s2373_s30, %s2369_s29  ;;  %s3785_s14 = smov (%p39_p0, %s37_s14), 0 }
   0xd   : > { %3574 = sst [smem:[#allocation13_spill]] %s3785_s14  ;;  %p2485_p4 = por %p52_p2, %p51_p1 }
   0xe   : > { %p58_p5 = scmp.eq.s32.totalorder %s1814_s7, 0  ;;  %s41_s17 = ssub.s32 %s2385_s11, %s3785_s14 }
   0xf   : > { %p230_p6 = scmp.eq.s32.totalorder %s1814_s7, 1  ;;  %p42_p7 = scmp.eq.s32.totalorder %s41_s17, 0 }
  0x10   : > { %p2491_p8 = por %p58_p5, %p57_p3  ;;  %p236_p10 = scmp.eq.s32.totalorder %s1815_s13, 1 }
  0x11   : > { %p2495_p9 = por %p230_p6, %p51_p1  ;;  %p1817_p12 = scmp.ge.s32.totalorder %s2389_s12, 2 }
  0x12   : > { %s2500_s20 = scalar_select %p42_p7, %s2377_s9, %s44_s15  }
  0x13   : > { %p2502_p11 = por %p236_p10, %p57_p3  ;;  %p2027_p13 = scmp.lt.s32.totalorder %s2389_s12, 2 }
  0x14   : > { %s277_s22 = sand.u32 1, %s2377_s9   ;;  %s2007_s24 = sshll.u32 %s2385_s11, 5 }
  0x15   : > { %s1818_s23 = sshll.u32 %s277_s22, 5  ;;  %s286_s27 = scalar_lea.hbm %s3443_s0, %s2007_s24 }
  0x16   : > { %s281_s28 = scalar_lea.vmem [#allocation6], %s1818_s23  ;;  %s287_s17 = sshll.u32 %s286_s27, 4  ;;  %s288_s17 = int_to_ptr.hbm [resolvable:$true] %s287_s17 }
  0x17   : > { %s289_s7 = sshll.u32 %s281_s28, 4  ;;  %p2020_p0 = pnand %p2027_p13, %p2485_p4  ;;  %s290_s7 = int_to_ptr.vmem [resolvable:$true] %s289_s7 }
  0x18   : > { %p1821_p1 = scmp.ge.s32.totalorder %s2389_s12, 1  ;;  %s278_s13 = scalar_lea.sflag [#allocation7], %s277_s22 }
  0x19   : > { %s2391_s15 = smov 256   ;;  %s2392_s14 = smov 16  }
  0x1a   : > { %2022 = dma.hbm_to_vmem [thread:$0]  (!%p2020_p0), %s288_s17, 512, %s290_s7, %s278_s13, %s2391_s15, %s2391_s15, %s2392_s14  }
  0x1b   : > { %p297_p2 = scmp.lt.s32.totalorder %s2389_s12, 3 }
  0x1d   : > { %p298_p3 = pnand %p1821_p1, %p297_p2 }
  0x1f   : > { %301 = sbr.rel (%p298_p3) target bundleno = 1305 (0x519), region = 52 }
  0x24   : > { %s2518_s11 = sand.u32 1, %s2373_s30  }
  0x25   : > { %s1822_s23 = sshll.u32 %s2518_s11, 5  ;;  %s304_s24 = scalar_lea.sflag [#allocation7], %s2518_s11 }
  0x26   : > { %s307_s16 = scalar_lea.vmem [#allocation6], %s1822_s23 }
  0x27   : > { %2360 = dma.done.wait (%p2491_p8), %s304_s24, 512  }
  0x28   : > { %2362 = vsyncadd (%p2491_p8), %s304_s24, 4294966784  ;;  %v2393_v0 = vmov 0   ;;  %v2528_v1 = vld [vmem:[%s307_s16 + $0x10] sm:$0xff]  ;;  %v2530_v2 = vld [vmem:[%s307_s16 + $0x18] sm:$0xff]  ;;  %vm357_vm0 = vcmask 130048   ;;  %vm404_vm1 = vcmask 1041408  }
  0x29   : > { %2083 = vset.pattern.permute.xlu0 %v2393_v0  ;;  %2084 = vset.pattern.permute.xlu2 %v2393_v0  ;;  %3579 = vst [vmem:[#allocation14_spill] sm:$0xff] %v2528_v1  ;;  %v2532_v3 = vld [vmem:[%s307_s16] sm:$0xff]  ;;  %v2536_v4 = vld [vmem:[%s307_s16 + $0x8] sm:$0xff]  ;;  %vm607_vm2 = vcmask 15360   ;;  %vm1356_vm3 = vcmask 0   ;;  %s3122_s26 = scalar_lea.vmem [#allocation9], %s1822_s23 }
  0x2a   : > { %3580 = vst [vmem:[#allocation15_spill] sm:$0xff] %v2530_v2  ;;  %375 = vmatpush.msra.mxu0 %v2528_v1  ;;  %395 = vmatpush.msra.mxu1 %v2530_v2  ;;  %v350_v5 = vld [vmem:[%s3446_s3] sm:$0x3]  ;;  %v409_v37 = vld [vmem:[%s3448_s5 + $0x8] sm:$0xff] }
  0x2b   : > { %3581 = vst [vmem:[#allocation16_spill] sm:$0xff] %v2532_v3  ;;  %v351_v6 = vld [vmem:[%s3447_s4] sm:$0x3]  ;;  %442 = vmatpush.msra.mxu2 %v2528_v1  ;;  %465 = vmatpush.msra.mxu3 %v2530_v2  ;;  %v411_v47 = vld [vmem:[%s3449_s6 + $0x8] sm:$0xff] }
  0x2c   : > { %3582 = vst [vmem:[#allocation17_spill] sm:$0xff] %v2536_v4  ;;  %354 = vperm.xlu0 %2083, %v351_v6   ;;  %376 = vmatpush.msra.mxu0 %v2532_v3  ;;  %v488_v7 = vld [vmem:[%s3445_s2] sm:$0x3] }
  0x2d   : > { %396 = vmatpush.msra.mxu1 %v2536_v4  ;;  %1824 = vmatmul.msk.f32.vlgmr.msra.gmra.mxu0 %vm357_vm0, %v350_v5  ;;  %v487_v8 = vld [vmem:[%s3444_s1] sm:$0x3] }
  0x2e   : > { %1825 = vmatmul.msk.f32.vlgmr.msra.gmra.mxu1 %vm357_vm0, %v350_v5  ;;  %512 = vmatpush.msrb.mxu0 %v2528_v1  ;;  %v408_v35 = vld [vmem:[%s3448_s5] sm:$0xff] }
  0x2f   : > { %532 = vmatpush.msrb.mxu1 %v2530_v2  ;;  %443 = vmatpush.msra.mxu2 %v2532_v3  ;;  %v410_v42 = vld [vmem:[%s3449_s6] sm:$0xff] }
  0x30   : > { %513 = vmatpush.msrb.mxu0 %v2532_v3  ;;  %466 = vmatpush.msra.mxu3 %v2536_v4 }
  0x31   : > { %533 = vmatpush.msrb.mxu1 %v2536_v4  ;;  %1826 = vmatmul.msk.f32.vlgmr.msra.gmra.mxu2 %vm357_vm0, %v408_v35 }
  0x32   : > { %1828 = vmatmul.msk.f32.vlgmr.msra.gmra.mxu3 %vm357_vm0, %v408_v35  ;;  %414 = vperm.xlu2 %2084, %v410_v42  }
  0x34   : > { %491 = vperm.xlu0 %2083, %v488_v7  }
  0x35   : > { %1830 = vmatmul.msk.f32.vlgmr.msrb.gmra.mxu0 %vm357_vm0, %v487_v8 }
  0x36   : > { %1831 = vmatmul.msk.f32.vlgmr.msrb.gmra.mxu1 %vm357_vm0, %v487_v8 }
  0x39   : > { %1827 = vmatmul.msk.f32.gmra.mxu2 %vm357_vm0, %v409_v37 }
  0x3a   : > { %1829 = vmatmul.msk.f32.gmra.mxu3 %vm357_vm0, %v409_v37  ;;  %419 = vperm.xlu2 %2084, %v411_v47  }
  0x8c   : > { %v415_v58 = vpop.permute.xlu2 %414 }
  0x94   : > { %v420_v5 = vpop.permute.xlu2 %419 }
  0x9e   : > { %v355_v9 = vpop.permute.xlu0 %354 }
  0xa6   : > { %v492_v16 = vpop.permute.xlu0 %491 }
  0xaa   : > { %v378_v10 = vpop.f32.mrf.mxu0 }
  0xab   : > { %v398_v11 = vpop.f32.mrf.mxu1  ;;  %v379_v13 = vadd.f32 %v378_v10, %v355_v9 }
  0xac   : > { %v399_v12 = vadd.f32 %v398_v11, %v355_v9 }
  0xae   : > { %v403_v14 = vrot.slane %v399_v12, 6 }
  0xb0   : > { %v405_v15 = vsel %vm404_vm1, %v379_v13, %v403_v14 }
  0xb1   : > { %407 = vst [vmem:[#allocation2] sm:$0xf] %v405_v15 }
  0xb2   : > { %v515_v17 = vpop.f32.mrf.mxu0 }
  0xb3   : > { %v516_v18 = vadd.f32 %v515_v17, %v492_v16  ;;  %v535_v22 = vpop.f32.mrf.mxu1 }
  0xb4   : > { %v536_v23 = vadd.f32 %v535_v22, %v492_v16  ;;  %v445_v59 = vpop.f32.mrf.mxu2 }
  0xb5   : > { %539 = vxpose.xlu1.b32.start.end [1/1] (short) %v516_v18, 128  ;;  %v468_v60 = vpop.f32.mrf.mxu3  ;;  %v446_v61 = vadd.f32 %v445_v59, %v415_v58 }
  0xb6   : > { %v469_v62 = vadd.f32 %v468_v60, %v415_v58 }
  0xb8   : > { %v538_v19 = vld [vmem:[#allocation2] sm:$0xf]  ;;  %v474_v0 = vpack.c.bf16 %v469_v62, %v446_v61 }
  0xb9   : > { %604 = vst [vmem:[#allocation1] ss:$4 sm:$0xff] %v538_v19 }
  0xba   : > { %476 = vst [vmem:[#allocation3] sm:$0xff] %v474_v0 }
  0xbc   : > { %v448_v6 = vpop.f32.mrf.mxu2 }
  0xbd   : > { %v471_v7 = vpop.f32.mrf.mxu3  ;;  %v449_v8 = vadd.f32 %v448_v6, %v420_v5 }
  0xbe   : > { %v472_v9 = vadd.f32 %v471_v7, %v420_v5 }
  0xc0   : > { %v605_v20 = vld.sshfl [vmem:[#allocation1] sm:$0xff pattern:$0x73625140]  ;;  %v606_v21 = vld.sshfl [vmem:[#allocation1 + $0x8] sm:$0xff pattern:$0x73625140]  ;;  %v475_v11 = vpack.c.bf16 %v472_v9, %v449_v8 }
  0xc1   : > { %1832 = vmatpush.msk.msra.mxu0 %vm404_vm1, %v605_v20  ;;  %2011 = vmatpush.msk.msrb.mxu2 %vm404_vm1, %v605_v20 }
  0xc2   : > { %1865 = vmatpush.msk.msra.mxu1 %vm404_vm1, %v606_v21  ;;  %2012 = vmatpush.msk.msrb.mxu3 %vm404_vm1, %v606_v21  ;;  %477 = vst [vmem:[#allocation3 + $0x8] sm:$0xff] %v475_v11 }
 0x135   : > { %571 = vxpose.xlu1.b32.start.end [1/1] (short) %v536_v23, 128 }
 0x159   : > { %v555_v24 = vpop.trf.xlu1 }
 0x15a   : > { %1833 = vmatmul.msk.f32.vlgmr.msra.gmra.mxu0 %vm607_vm2, %v555_v24  ;;  %1866 = vmatmul.msk.f32.vlgmr.msra.gmra.mxu1 %vm607_vm2, %v555_v24 }
 0x161   : > { %v556_v25 = vpop.trf.xlu1 }
 0x162   : > { %1834 = vmatmul.msk.f32.gmra.mxu0 %vm607_vm2, %v556_v25  ;;  %1867 = vmatmul.msk.f32.gmra.mxu1 %vm607_vm2, %v556_v25 }
 0x169   : > { %v557_v26 = vpop.trf.xlu1 }
 0x16a   : > { %1835 = vmatmul.msk.f32.gmra.mxu0 %vm607_vm2, %v557_v26  ;;  %1868 = vmatmul.msk.f32.gmra.mxu1 %vm607_vm2, %v557_v26 }
 0x171   : > { %v558_v27 = vpop.trf.xlu1 }
 0x172   : > { %1836 = vmatmul.msk.f32.gmra.mxu0 %vm607_vm2, %v558_v27  ;;  %1869 = vmatmul.msk.f32.gmra.mxu1 %vm607_vm2, %v558_v27 }
 0x179   : > { %v559_v28 = vpop.trf.xlu1 }
 0x17a   : > { %1837 = vmatmul.msk.f32.gmra.mxu0 %vm607_vm2, %v559_v28  ;;  %1870 = vmatmul.msk.f32.gmra.mxu1 %vm607_vm2, %v559_v28 }
 0x181   : > { %v560_v29 = vpop.trf.xlu1 }
 0x182   : > { %1838 = vmatmul.msk.f32.gmra.mxu0 %vm607_vm2, %v560_v29  ;;  %1871 = vmatmul.msk.f32.gmra.mxu1 %vm607_vm2, %v560_v29 }
 0x189   : > { %v561_v30 = vpop.trf.xlu1 }
 0x18a   : > { %1839 = vmatmul.msk.f32.gmra.mxu0 %vm607_vm2, %v561_v30  ;;  %1872 = vmatmul.msk.f32.gmra.mxu1 %vm607_vm2, %v561_v30 }
 0x191   : > { %v562_v31 = vpop.trf.xlu1 }
 0x192   : > { %1840 = vmatmul.msk.f32.gmra.mxu0 %vm607_vm2, %v562_v31  ;;  %1873 = vmatmul.msk.f32.gmra.mxu1 %vm607_vm2, %v562_v31 }
 0x199   : > { %v563_v32 = vpop.trf.xlu1 }
 0x19a   : > { %1841 = vmatmul.msk.f32.gmra.mxu0 %vm607_vm2, %v563_v32  ;;  %1874 = vmatmul.msk.f32.gmra.mxu1 %vm607_vm2, %v563_v32 }
 0x1a1   : > { %v564_v33 = vpop.trf.xlu1 }
 0x1a2   : > { %1842 = vmatmul.msk.f32.gmra.mxu0 %vm607_vm2, %v564_v33  ;;  %1875 = vmatmul.msk.f32.gmra.mxu1 %vm607_vm2, %v564_v33 }
 0x1a9   : > { %v565_v34 = vpop.trf.xlu1 }
 0x1aa   : > { %1843 = vmatmul.msk.f32.gmra.mxu0 %vm607_vm2, %v565_v34  ;;  %1876 = vmatmul.msk.f32.gmra.mxu1 %vm607_vm2, %v565_v34 }
 0x1b1   : > { %v566_v36 = vpop.trf.xlu1 }
 0x1b2   : > { %1844 = vmatmul.msk.f32.gmra.mxu0 %vm607_vm2, %v566_v36  ;;  %1877 = vmatmul.msk.f32.gmra.mxu1 %vm607_vm2, %v566_v36 }
 0x1b9   : > { %v567_v38 = vpop.trf.xlu1 }
 0x1ba   : > { %1845 = vmatmul.msk.f32.gmra.mxu0 %vm607_vm2, %v567_v38  ;;  %1878 = vmatmul.msk.f32.gmra.mxu1 %vm607_vm2, %v567_v38 }
 0x1c1   : > { %v568_v39 = vpop.trf.xlu1 }
 0x1c2   : > { %1846 = vmatmul.msk.f32.gmra.mxu0 %vm607_vm2, %v568_v39  ;;  %1879 = vmatmul.msk.f32.gmra.mxu1 %vm607_vm2, %v568_v39 }
 0x1c9   : > { %v569_v40 = vpop.trf.xlu1 }
 0x1ca   : > { %1847 = vmatmul.msk.f32.gmra.mxu0 %vm607_vm2, %v569_v40  ;;  %1880 = vmatmul.msk.f32.gmra.mxu1 %vm607_vm2, %v569_v40 }
 0x1d1   : > { %v570_v41 = vpop.trf.xlu1 }
 0x1d2   : > { %1848 = vmatmul.msk.f32.gmra.mxu0 %vm607_vm2, %v570_v41  ;;  %1881 = vmatmul.msk.f32.gmra.mxu1 %vm607_vm2, %v570_v41 }
 0x1d7   : > { %v2614_v43 = vpop.f32.mrf.mxu0  ;;  %v2616_v44 = vpop.f32.mrf.mxu1 }
 0x1d8   : > { %3583 = vst [vmem:[#allocation18_spill] sm:$0xff] %v2614_v43  ;;  %v935_v45 = vmax.f32 %v2614_v43, %v2616_v44 }
 0x1d9   : > { %3584 = vst [vmem:[#allocation19_spill] sm:$0xff] %v2616_v44  ;;  %v587_v46 = vpop.trf.xlu1 }
 0x1da   : > { %1849 = vmatmul.msk.f32.vlgmr.msrb.gmra.mxu2 %vm607_vm2, %v587_v46  ;;  %1882 = vmatmul.msk.f32.vlgmr.msrb.gmra.mxu3 %vm607_vm2, %v587_v46 }
 0x1db   : > { %936 = vmax.xlane.f32.xlu0 %v935_v45 }
 0x1df   : > { %v2651_v13 = vpop.f32.mrf.mxu0  ;;  %v2653_v14 = vpop.f32.mrf.mxu1 }
 0x1e0   : > { %3585 = vst [vmem:[#allocation20_spill] sm:$0xff] %v2651_v13  ;;  %v938_v29 = vmax.f32 %v2651_v13, %v2653_v14 }
 0x1e1   : > { %v588_v48 = vpop.trf.xlu1  ;;  %3586 = vst [vmem:[#allocation21_spill] sm:$0xff] %v2653_v14 }
 0x1e2   : > { %1850 = vmatmul.msk.f32.gmra.mxu2 %vm607_vm2, %v588_v48  ;;  %1883 = vmatmul.msk.f32.gmra.mxu3 %vm607_vm2, %v588_v48 }
 0x1e7   : > { %v2657_v16 = vpop.f32.mrf.mxu0  ;;  %v2659_v17 = vpop.f32.mrf.mxu1 }
 0x1e8   : > { %3587 = vst [vmem:[#allocation22_spill] sm:$0xff] %v2657_v16  ;;  %v941_v34 = vmax.f32 %v2657_v16, %v2659_v17 }
 0x1e9   : > { %v589_v49 = vpop.trf.xlu1  ;;  %3588 = vst [vmem:[#allocation23_spill] sm:$0xff] %v2659_v17 }
 0x1ea   : > { %1851 = vmatmul.msk.f32.gmra.mxu2 %vm607_vm2, %v589_v49  ;;  %1884 = vmatmul.msk.f32.gmra.mxu3 %vm607_vm2, %v589_v49 }
 0x1ef   : > { %v2663_v19 = vpop.f32.mrf.mxu0  ;;  %v2665_v20 = vpop.f32.mrf.mxu1 }
 0x1f0   : > { %3589 = vst [vmem:[#allocation24_spill] sm:$0xff] %v2663_v19  ;;  %v944_v35 = vmax.f32 %v2663_v19, %v2665_v20 }
 0x1f1   : > { %v590_v50 = vpop.trf.xlu1  ;;  %3590 = vst [vmem:[#allocation25_spill] sm:$0xff] %v2665_v20 }
 0x1f2   : > { %1852 = vmatmul.msk.f32.gmra.mxu2 %vm607_vm2, %v590_v50  ;;  %1885 = vmatmul.msk.f32.gmra.mxu3 %vm607_vm2, %v590_v50 }
 0x1f7   : > { %v2673_v24 = vpop.f32.mrf.mxu0  ;;  %v2675_v25 = vpop.f32.mrf.mxu1 }
 0x1f8   : > { %3593 = vst [vmem:[#allocation28_spill] sm:$0xff] %v2673_v24  ;;  %v947_v46 = vmax.f32 %v2673_v24, %v2675_v25 }
 0x1f9   : > { %v591_v51 = vpop.trf.xlu1  ;;  %3594 = vst [vmem:[#allocation29_spill] sm:$0xff] %v2675_v25 }
 0x1fa   : > { %1853 = vmatmul.msk.f32.gmra.mxu2 %vm607_vm2, %v591_v51  ;;  %1886 = vmatmul.msk.f32.gmra.mxu3 %vm607_vm2, %v591_v51 }
 0x1ff   : > { %v2689_v32 = vpop.f32.mrf.mxu0  ;;  %v2691_v33 = vpop.f32.mrf.mxu1 }
 0x200   : > { %3599 = vst [vmem:[#allocation34_spill] sm:$0xff] %v2689_v32  ;;  %v950_v47 = vmax.f32 %v2689_v32, %v2691_v33 }
 0x201   : > { %v592_v52 = vpop.trf.xlu1  ;;  %3600 = vst [vmem:[#allocation35_spill] sm:$0xff] %v2691_v33 }
 0x202   : > { %1854 = vmatmul.msk.f32.gmra.mxu2 %vm607_vm2, %v592_v52  ;;  %1887 = vmatmul.msk.f32.gmra.mxu3 %vm607_vm2, %v592_v52 }
 0x207   : > { %v2705_v40 = vpop.f32.mrf.mxu0  ;;  %v2707_v41 = vpop.f32.mrf.mxu1 }
 0x208   : > { %3603 = vst [vmem:[#allocation38_spill] sm:$0xff] %v2705_v40  ;;  %v953_v59 = vmax.f32 %v2705_v40, %v2707_v41 }
 0x209   : > { %v593_v53 = vpop.trf.xlu1  ;;  %3604 = vst [vmem:[#allocation39_spill] sm:$0xff] %v2707_v41 }
 0x20a   : > { %1855 = vmatmul.msk.f32.gmra.mxu2 %vm607_vm2, %v593_v53  ;;  %1888 = vmatmul.msk.f32.gmra.mxu3 %vm607_vm2, %v593_v53 }
 0x20f   : > { %v2717_v48 = vpop.f32.mrf.mxu0  ;;  %v2719_v49 = vpop.f32.mrf.mxu1 }
 0x210   : > { %3607 = vst [vmem:[#allocation42_spill] sm:$0xff] %v2717_v48  ;;  %v956_v60 = vmax.f32 %v2717_v48, %v2719_v49 }
 0x211   : > { %v594_v54 = vpop.trf.xlu1  ;;  %3608 = vst [vmem:[#allocation43_spill] sm:$0xff] %v2719_v49 }
 0x212   : > { %1856 = vmatmul.msk.f32.gmra.mxu2 %vm607_vm2, %v594_v54  ;;  %1889 = vmatmul.msk.f32.gmra.mxu3 %vm607_vm2, %v594_v54 }
 0x217   : > { %v2729_v54 = vpop.f32.mrf.mxu0 }
 0x219   : > { %v595_v55 = vpop.trf.xlu1 }
 0x21a   : > { %1857 = vmatmul.msk.f32.gmra.mxu2 %vm607_vm2, %v595_v55  ;;  %1890 = vmatmul.msk.f32.gmra.mxu3 %vm607_vm2, %v595_v55  ;;  %v2731_v55 = vpop.f32.mrf.mxu1 }
 0x21b   : > { %3611 = vst [vmem:[#allocation46_spill] sm:$0xff] %v2731_v55  ;;  %v959_v9 = vmax.f32 %v2729_v54, %v2731_v55 }
 0x221   : > { %v596_v56 = vpop.trf.xlu1 }
 0x222   : > { %1858 = vmatmul.msk.f32.gmra.mxu2 %vm607_vm2, %v596_v56  ;;  %1891 = vmatmul.msk.f32.gmra.mxu3 %vm607_vm2, %v596_v56  ;;  %v2749_v0 = vpop.f32.mrf.mxu1 }
 0x223   : > { %3617 = vst [vmem:[#allocation52_spill] sm:$0xff] %v2749_v0 }
 0x229   : > { %v597_v57 = vpop.trf.xlu1 }
 0x22a   : > { %1859 = vmatmul.msk.f32.gmra.mxu2 %vm607_vm2, %v597_v57  ;;  %1892 = vmatmul.msk.f32.gmra.mxu3 %vm607_vm2, %v597_v57  ;;  %v2763_v11 = vpop.f32.mrf.mxu1 }
 0x231   : > { %v598_v63 = vpop.trf.xlu1 }
 0x232   : > { %1860 = vmatmul.msk.f32.gmra.mxu2 %vm607_vm2, %v598_v63  ;;  %1893 = vmatmul.msk.f32.gmra.mxu3 %vm607_vm2, %v598_v63  ;;  %v2747_v63 = vpop.f32.mrf.mxu0 }
 0x233   : > { %3616 = vst [vmem:[#allocation51_spill] sm:$0xff] %v2747_v63 }
 0x239   : > { %v599_v10 = vpop.trf.xlu1 }
 0x23a   : > { %1861 = vmatmul.msk.f32.gmra.mxu2 %vm607_vm2, %v599_v10  ;;  %1894 = vmatmul.msk.f32.gmra.mxu3 %vm607_vm2, %v599_v10  ;;  %v2761_v10 = vpop.f32.mrf.mxu0 }
 0x241   : > { %v600_v12 = vpop.trf.xlu1 }
 0x242   : > { %1862 = vmatmul.msk.f32.gmra.mxu2 %vm607_vm2, %v600_v12  ;;  %1895 = vmatmul.msk.f32.gmra.mxu3 %vm607_vm2, %v600_v12 }
 0x249   : > { %v601_v15 = vpop.trf.xlu1 }
 0x24a   : > { %1863 = vmatmul.msk.f32.gmra.mxu2 %vm607_vm2, %v601_v15  ;;  %1896 = vmatmul.msk.f32.gmra.mxu3 %vm607_vm2, %v601_v15 }
 0x24e   : > { %v2821_v4 = vpop.xlane.xlu0 %936 }
 0x24f   : > { %3628 = vst [vmem:[#allocation63_spill] sm:$0xff] %v2821_v4 }
 0x251   : > { %v602_v18 = vpop.trf.xlu1 }
 0x252   : > { %1864 = vmatmul.msk.f32.gmra.mxu2 %vm607_vm2, %v602_v18  ;;  %1897 = vmatmul.msk.f32.gmra.mxu3 %vm607_vm2, %v602_v18 }
 0x25d   : > { %v2667_v21 = vpop.f32.mrf.mxu2  ;;  %v2669_v22 = vpop.f32.mrf.mxu3 }
 0x25e   : > { %3591 = vst [vmem:[#allocation26_spill] sm:$0xff] %v2667_v21  ;;  %v983_v23 = vmax.f32 %v2667_v21, %v2669_v22 }
 0x25f   : > { %3592 = vst [vmem:[#allocation27_spill] sm:$0xff] %v2669_v22 }
 0x260   : > { %984 = vmax.xlane.f32.xlu2 %v983_v23  ;;  %v962_v23 = vmax.f32 %v2747_v63, %v2749_v0 }
 0x265   : > { %v2677_v26 = vpop.f32.mrf.mxu2  ;;  %v2679_v27 = vpop.f32.mrf.mxu3 }
 0x266   : > { %3595 = vst [vmem:[#allocation30_spill] sm:$0xff] %v2677_v26  ;;  %v986_v28 = vmax.f32 %v2677_v26, %v2679_v27 }
 0x267   : > { %3596 = vst [vmem:[#allocation31_spill] sm:$0xff] %v2679_v27 }
 0x268   : > { %987 = vmax.xlane.f32.xlu0 %v986_v28  ;;  %939 = vmax.xlane.f32.xlu2 %v938_v29  ;;  %v2773_v28 = vpop.f32.mrf.mxu0  ;;  %v2775_v29 = vpop.f32.mrf.mxu1 }
 0x26d   : > { %v2685_v30 = vpop.f32.mrf.mxu2  ;;  %v2687_v31 = vpop.f32.mrf.mxu3 }
 0x26e   : > { %3597 = vst [vmem:[#allocation32_spill] sm:$0xff] %v2685_v30  ;;  %v989_v38 = vmax.f32 %v2685_v30, %v2687_v31 }
 0x26f   : > { %3598 = vst [vmem:[#allocation33_spill] sm:$0xff] %v2687_v31 }
 0x270   : > { %942 = vmax.xlane.f32.xlu2 %v941_v34  ;;  %945 = vmax.xlane.f32.xlu0 %v944_v35 }
 0x275   : > { %v2697_v36 = vpop.f32.mrf.mxu2  ;;  %v2699_v37 = vpop.f32.mrf.mxu3 }
 0x276   : > { %3601 = vst [vmem:[#allocation36_spill] sm:$0xff] %v2697_v36  ;;  %v992_v39 = vmax.f32 %v2697_v36, %v2699_v37 }
 0x277   : > { %3602 = vst [vmem:[#allocation37_spill] sm:$0xff] %v2699_v37 }
 0x278   : > { %990 = vmax.xlane.f32.xlu2 %v989_v38  ;;  %993 = vmax.xlane.f32.xlu0 %v992_v39  ;;  %v965_v39 = vmax.f32 %v2761_v10, %v2763_v11 }
 0x27d   : > { %v2709_v42 = vpop.f32.mrf.mxu2  ;;  %v2711_v45 = vpop.f32.mrf.mxu3 }
 0x27e   : > { %3605 = vst [vmem:[#allocation40_spill] sm:$0xff] %v2709_v42  ;;  %v995_v52 = vmax.f32 %v2709_v42, %v2711_v45 }
 0x27f   : > { %3606 = vst [vmem:[#allocation41_spill] sm:$0xff] %v2711_v45 }
 0x280   : > { %948 = vmax.xlane.f32.xlu2 %v947_v46  ;;  %951 = vmax.xlane.f32.xlu0 %v950_v47  ;;  %v2785_v46 = vpop.f32.mrf.mxu0  ;;  %v2787_v47 = vpop.f32.mrf.mxu1 }
 0x285   : > { %v2721_v50 = vpop.f32.mrf.mxu2  ;;  %v2723_v51 = vpop.f32.mrf.mxu3 }
 0x286   : > { %3609 = vst [vmem:[#allocation44_spill] sm:$0xff] %v2721_v50  ;;  %v998_v53 = vmax.f32 %v2721_v50, %v2723_v51 }
 0x287   : > { %3610 = vst [vmem:[#allocation45_spill] sm:$0xff] %v2723_v51 }
 0x288   : > { %996 = vmax.xlane.f32.xlu2 %v995_v52  ;;  %999 = vmax.xlane.f32.xlu0 %v998_v53 }
 0x28d   : > { %v2733_v56 = vpop.f32.mrf.mxu2  ;;  %v2735_v57 = vpop.f32.mrf.mxu3 }
 0x28e   : > { %3612 = vst [vmem:[#allocation47_spill] sm:$0xff] %v2733_v56  ;;  %v1001_v58 = vmax.f32 %v2733_v56, %v2735_v57 }
 0x28f   : > { %3613 = vst [vmem:[#allocation48_spill] sm:$0xff] %v2735_v57 }
 0x290   : > { %1002 = vmax.xlane.f32.xlu1 %v1001_v58  ;;  %954 = vmax.xlane.f32.xlu2 %v953_v59  ;;  %v968_v59 = vmax.f32 %v2773_v28, %v2775_v29 }
 0x291   : > { %957 = vmax.xlane.f32.xlu0 %v956_v60 }
 0x295   : > { %v2743_v61 = vpop.f32.mrf.mxu2  ;;  %v2745_v62 = vpop.f32.mrf.mxu3 }
 0x296   : > { %3614 = vst [vmem:[#allocation49_spill] sm:$0xff] %v2743_v61  ;;  %v1004_v5 = vmax.f32 %v2743_v61, %v2745_v62 }
 0x297   : > { %3615 = vst [vmem:[#allocation50_spill] sm:$0xff] %v2745_v62 }
 0x298   : > { %1005 = vmax.xlane.f32.xlu2 %v1004_v5 }
 0x29d   : > { %v2753_v6 = vpop.f32.mrf.mxu2  ;;  %v2755_v7 = vpop.f32.mrf.mxu3 }
 0x29e   : > { %3618 = vst [vmem:[#allocation53_spill] sm:$0xff] %v2753_v6  ;;  %v1007_v8 = vmax.f32 %v2753_v6, %v2755_v7 }
 0x29f   : > { %3619 = vst [vmem:[#allocation54_spill] sm:$0xff] %v2755_v7 }
 0x2a0   : > { %1008 = vmax.xlane.f32.xlu0 %v1007_v8  ;;  %960 = vmax.xlane.f32.xlu2 %v959_v9  ;;  %v2801_v8 = vpop.f32.mrf.mxu0 }
 0x2a1   : > { %3623 = vst [vmem:[#allocation58_spill] sm:$0xff] %v2801_v8 }
 0x2a5   : > { %v2765_v12 = vpop.f32.mrf.mxu2  ;;  %v2767_v15 = vpop.f32.mrf.mxu3 }
 0x2a6   : > { %3620 = vst [vmem:[#allocation55_spill] sm:$0xff] %v2765_v12  ;;  %v1010_v18 = vmax.f32 %v2765_v12, %v2767_v15 }
 0x2a7   : > { %3621 = vst [vmem:[#allocation56_spill] sm:$0xff] %v2767_v15 }
 0x2a8   : > { %1011 = vmax.xlane.f32.xlu2 %v1010_v18  ;;  %963 = vmax.xlane.f32.xlu0 %v962_v23  ;;  %v971_v18 = vmax.f32 %v2785_v46, %v2787_v47  ;;  %v2807_v23 = vpop.f32.mrf.mxu1  ;;  %v2817_v2 = vpop.f32.mrf.mxu0 }
 0x2a9   : > { %3624 = vst [vmem:[#allocation59_spill] sm:$0xff] %v2807_v23 }
 0x2ad   : > { %v2777_v34 = vpop.f32.mrf.mxu2  ;;  %v2779_v35 = vpop.f32.mrf.mxu3 }
 0x2ae   : > { %v1013_v38 = vmax.f32 %v2777_v34, %v2779_v35 }
 0x2b0   : > { %1014 = vmax.xlane.f32.xlu0 %v1013_v38  ;;  %966 = vmax.xlane.f32.xlu2 %v965_v39  ;;  %v2819_v1 = vpop.f32.mrf.mxu1 }
 0x2b1   : > { %3627 = vst [vmem:[#allocation62_spill] sm:$0xff] %v2819_v1 }
 0x2b5   : > { %v2789_v52 = vpop.f32.mrf.mxu2  ;;  %v2791_v53 = vpop.f32.mrf.mxu3 }
 0x2b6   : > { %v1016_v58 = vmax.f32 %v2789_v52, %v2791_v53 }
 0x2b8   : > { %1017 = vmax.xlane.f32.xlu2 %v1016_v58  ;;  %969 = vmax.xlane.f32.xlu0 %v968_v59  ;;  %v974_v59 = vmax.f32 %v2801_v8, %v2807_v23  ;;  %v2835_v8 = vpop.f32.mrf.mxu0 }
 0x2b9   : > { %3631 = vst [vmem:[#allocation66_spill] sm:$0xff] %v2835_v8 }
 0x2bd   : > { %v2797_v60 = vpop.f32.mrf.mxu2  ;;  %v2799_v5 = vpop.f32.mrf.mxu3 }
 0x2be   : > { %3622 = vst [vmem:[#allocation57_spill] sm:$0xff] %v2799_v5  ;;  %v1019_v9 = vmax.f32 %v2797_v60, %v2799_v5 }
 0x2c0   : > { %1020 = vmax.xlane.f32.xlu0 %v1019_v9  ;;  %972 = vmax.xlane.f32.xlu2 %v971_v18  ;;  %v1031_v9 = vsub.f32 %v2614_v43, %v2821_v4  ;;  %v1032_v18 = vsub.f32 %v2616_v44, %v2821_v4  ;;  %v2837_v43 = vpop.f32.mrf.mxu1 }
 0x2c1   : > { %3632 = vst [vmem:[#allocation67_spill] sm:$0xff] %v2837_v43 }
 0x2c2   : > { %v1097_v23 = vmul.f32 1.442695, %v1032_v18 }
 0x2c5   : > { %v2809_v38 = vpop.f32.mrf.mxu2  ;;  %v2811_v39 = vpop.f32.mrf.mxu3 }
 0x2c6   : > { %3625 = vst [vmem:[#allocation60_spill] sm:$0xff] %v2809_v38  ;;  %v1022_v58 = vmax.f32 %v2809_v38, %v2811_v39 }
 0x2c7   : > { %3626 = vst [vmem:[#allocation61_spill] sm:$0xff] %v2811_v39 }
 0x2c8   : > { %1023 = vmax.xlane.f32.xlu2 %v1022_v58  ;;  %975 = vmax.xlane.f32.xlu0 %v974_v59  ;;  %v977_v58 = vmax.f32 %v2817_v2, %v2819_v1  ;;  %v1095_v59 = vmul.f32 1.442695, %v1031_v9 }
 0x2ca   : > { %2085 = vpow2.f32 %v1095_v59 }
 0x2cb   : > { %2087 = vpow2.f32 %v1097_v23 }
 0x2cd   : > { %v2827_v3 = vpop.f32.mrf.mxu2  ;;  %v2829_v39 = vpop.f32.mrf.mxu3 }
 0x2ce   : > { %3629 = vst [vmem:[#allocation64_spill] sm:$0xff] %v2827_v3  ;;  %v1025_v38 = vmax.f32 %v2827_v3, %v2829_v39 }
 0x2cf   : > { %3630 = vst [vmem:[#allocation65_spill] sm:$0xff] %v2829_v39 }
 0x2d0   : > { %1026 = vmax.xlane.f32.xlu0 %v1025_v38  ;;  %978 = vmax.xlane.f32.xlu2 %v977_v58  ;;  %v980_v38 = vmax.f32 %v2835_v8, %v2837_v43  ;;  %v2086_v3 = vpop.eup %2085 }
 0x2d3   : > { %v2839_v5 = vpop.xlane.xlu2 %984 }
 0x2d4   : > { %3633 = vst [vmem:[#allocation68_spill] sm:$0xff] %v2839_v5  ;;  %v1063_v44 = vsub.f32 %v2667_v21, %v2839_v5  ;;  %v1064_v4 = vsub.f32 %v2669_v22, %v2839_v5  ;;  %v2088_v21 = vpop.eup %2087 }
 0x2d5   : > { %v2845_v39 = vpop.f32.mrf.mxu2  ;;  %v2847_v9 = vpop.f32.mrf.mxu3 }
 0x2d6   : > { %3634 = vst [vmem:[#allocation69_spill] sm:$0xff] %v2845_v39  ;;  %v1028_v18 = vmax.f32 %v2845_v39, %v2847_v9  ;;  %v1159_v58 = vmul.f32 1.442695, %v1063_v44  ;;  %v1161_v59 = vmul.f32 1.442695, %v1064_v4 }
 0x2d7   : > { %3635 = vst [vmem:[#allocation70_spill] sm:$0xff] %v2847_v9 }
 0x2d8   : > { %1029 = vmax.xlane.f32.xlu2 %v1028_v18  ;;  %981 = vmax.xlane.f32.xlu0 %v980_v38  ;;  %2089 = vpow2.f32 %v1159_v58  ;;  %v1223_v38 = vadd.f32 %v2088_v21, %v2086_v3 }
 0x2d9   : > { %2091 = vpow2.f32 %v1161_v59 }
 0x2db   : > { %v2853_v23 = vpop.xlane.xlu0 %987  ;;  %v2855_v1 = vpop.xlane.xlu2 %939 }
 0x2dc   : > { %3636 = vst [vmem:[#allocation71_spill] sm:$0xff] %v2853_v23  ;;  %v1033_v22 = vsub.f32 %v2651_v13, %v2855_v1  ;;  %v1034_v5 = vsub.f32 %v2653_v14, %v2855_v1  ;;  %v1065_v44 = vsub.f32 %v2677_v26, %v2853_v23  ;;  %v1066_v4 = vsub.f32 %v2679_v27, %v2853_v23 }
 0x2dd   : > { %3637 = vst [vmem:[#allocation72_spill] sm:$0xff] %v2855_v1 }
 0x2de   : > { %v1099_v18 = vmul.f32 1.442695, %v1033_v22  ;;  %v1101_v9 = vmul.f32 1.442695, %v1034_v5  ;;  %v1163_v39 = vmul.f32 1.442695, %v1065_v44  ;;  %v2090_v43 = vpop.eup %2089 }
 0x2df   : > { %v2092_v58 = vpop.eup %2091  ;;  %v1165_v8 = vmul.f32 1.442695, %v1066_v4 }
 0x2e0   : > { %1224 = vadd.xlane.f32.xlu0 %v1223_v38  ;;  %2093 = vpow2.f32 %v1099_v18  ;;  %v1271_v44 = vadd.f32 %v2092_v58, %v2090_v43 }
 0x2e1   : > { %2095 = vpow2.f32 %v1101_v9 }
 0x2e2   : > { %2097 = vpow2.f32 %v1163_v39 }
 0x2e3   : > { %v2865_v13 = vpop.xlane.xlu2 %942  ;;  %v2867_v14 = vpop.xlane.xlu0 %945  ;;  %2099 = vpow2.f32 %v1165_v8 }
 0x2e4   : > { %3638 = vst [vmem:[#allocation73_spill] sm:$0xff] %v2865_v13  ;;  %v1035_v59 = vsub.f32 %v2657_v16, %v2865_v13  ;;  %v1036_v3 = vsub.f32 %v2659_v17, %v2865_v13  ;;  %v1037_v5 = vsub.f32 %v2663_v19, %v2867_v14  ;;  %v1038_v9 = vsub.f32 %v2665_v20, %v2867_v14 }
 0x2e5   : > { %3639 = vst [vmem:[#allocation74_spill] sm:$0xff] %v2867_v14 }
 0x2e6   : > { %v1103_v21 = vmul.f32 1.442695, %v1035_v59  ;;  %v1105_v22 = vmul.f32 1.442695, %v1036_v3  ;;  %v2094_v18 = vpop.eup %2093  ;;  %v1107_v4 = vmul.f32 1.442695, %v1037_v5 }
 0x2e7   : > { %v2096_v38 = vpop.eup %2095  ;;  %v1109_v23 = vmul.f32 1.442695, %v1038_v9 }
 0x2e8   : > { %2101 = vpow2.f32 %v1103_v21  ;;  %1272 = vadd.xlane.f32.xlu0 %v1271_v44  ;;  %v1226_v27 = vadd.f32 %v2096_v38, %v2094_v18  ;;  %v2098_v26 = vpop.eup %2097 }
 0x2e9   : > { %2103 = vpow2.f32 %v1105_v22  ;;  %v2100_v58 = vpop.eup %2099 }
 0x2ea   : > { %1227 = vadd.xlane.f32.xlu2 %v1226_v27  ;;  %2105 = vpow2.f32 %v1107_v4  ;;  %v1274_v38 = vadd.f32 %v2100_v58, %v2098_v26 }
 0x2eb   : > { %v2877_v39 = vpop.xlane.xlu2 %990  ;;  %v2879_v59 = vpop.xlane.xlu0 %993  ;;  %2107 = vpow2.f32 %v1109_v23 }
 0x2ec   : > { %3640 = vst [vmem:[#allocation75_spill] sm:$0xff] %v2877_v39  ;;  %v1067_v43 = vsub.f32 %v2685_v30, %v2877_v39  ;;  %v1068_v8 = vsub.f32 %v2687_v31, %v2877_v39  ;;  %v1069_v5 = vsub.f32 %v2697_v36, %v2879_v59  ;;  %v1070_v9 = vsub.f32 %v2699_v37, %v2879_v59 }
 0x2ed   : > { %3641 = vst [vmem:[#allocation76_spill] sm:$0xff] %v2879_v59 }
 0x2ee   : > { %v2102_v3 = vpop.eup %2101  ;;  %v1167_v21 = vmul.f32 1.442695, %v1067_v43  ;;  %v1169_v22 = vmul.f32 1.442695, %v1068_v8  ;;  %v1171_v18 = vmul.f32 1.442695, %v1069_v5 }
 0x2ef   : > { %v2104_v44 = vpop.eup %2103  ;;  %v1173_v1 = vmul.f32 1.442695, %v1070_v9 }
 0x2f0   : > { %2109 = vpow2.f32 %v1167_v21  ;;  %v1229_v27 = vadd.f32 %v2104_v44, %v2102_v3  ;;  %v2106_v43 = vpop.eup %2105 }
 0x2f1   : > { %2111 = vpow2.f32 %v1169_v22  ;;  %v2108_v37 = vpop.eup %2107 }
 0x2f2   : > { %1230 = vadd.xlane.f32.xlu0 %v1229_v27  ;;  %1275 = vadd.xlane.f32.xlu2 %v1274_v38  ;;  %2113 = vpow2.f32 %v1171_v18  ;;  %v1232_v27 = vadd.f32 %v2108_v37, %v2106_v43 }
 0x2f3   : > { %v2889_v31 = vpop.xlane.xlu2 %948  ;;  %v2891_v4 = vpop.xlane.xlu0 %951  ;;  %2115 = vpow2.f32 %v1173_v1 }
 0x2f4   : > { %3642 = vst [vmem:[#allocation77_spill] sm:$0xff] %v2889_v31  ;;  %v1039_v8 = vsub.f32 %v2673_v24, %v2889_v31  ;;  %v1040_v23 = vsub.f32 %v2675_v25, %v2889_v31  ;;  %v1041_v26 = vsub.f32 %v2689_v32, %v2891_v4  ;;  %v1042_v5 = vsub.f32 %v2691_v33, %v2891_v4 }
 0x2f5   : > { %3643 = vst [vmem:[#allocation78_spill] sm:$0xff] %v2891_v4 }
 0x2f6   : > { %v2110_v21 = vpop.eup %2109  ;;  %v1111_v3 = vmul.f32 1.442695, %v1039_v8  ;;  %v1113_v22 = vmul.f32 1.442695, %v1040_v23  ;;  %v1115_v9 = vmul.f32 1.442695, %v1041_v26 }
 0x2f7   : > { %v2112_v58 = vpop.eup %2111  ;;  %v1117_v38 = vmul.f32 1.442695, %v1042_v5 }
 0x2f8   : > { %2117 = vpow2.f32 %v1111_v3  ;;  %v1277_v44 = vadd.f32 %v2112_v58, %v2110_v21  ;;  %v2114_v8 = vpop.eup %2113 }
 0x2f9   : > { %2119 = vpow2.f32 %v1113_v22  ;;  %v2116_v59 = vpop.eup %2115 }
 0x2fa   : > { %1278 = vadd.xlane.f32.xlu0 %v1277_v44  ;;  %1233 = vadd.xlane.f32.xlu2 %v1232_v27  ;;  %2121 = vpow2.f32 %v1115_v9  ;;  %v1280_v5 = vadd.f32 %v2116_v59, %v2114_v8 }
 0x2fb   : > { %v2901_v36 = vpop.xlane.xlu2 %996  ;;  %v2903_v18 = vpop.xlane.xlu0 %999  ;;  %2123 = vpow2.f32 %v1117_v38 }
 0x2fc   : > { %3644 = vst [vmem:[#allocation79_spill] sm:$0xff] %v2901_v36  ;;  %v1071_v23 = vsub.f32 %v2709_v42, %v2901_v36  ;;  %v1072_v1 = vsub.f32 %v2711_v45, %v2901_v36  ;;  %v1073_v43 = vsub.f32 %v2721_v50, %v2903_v18  ;;  %v1074_v58 = vsub.f32 %v2723_v51, %v2903_v18 }
 0x2fd   : > { %3645 = vst [vmem:[#allocation80_spill] sm:$0xff] %v2903_v18 }
 0x2fe   : > { %v2118_v3 = vpop.eup %2117  ;;  %v1175_v21 = vmul.f32 1.442695, %v1071_v23  ;;  %v1177_v22 = vmul.f32 1.442695, %v1072_v1  ;;  %v1179_v23 = vmul.f32 1.442695, %v1073_v43 }
 0x2ff   : > { %v2120_v37 = vpop.eup %2119 }
 0x300   : > { %2125 = vpow2.f32 %v1175_v21  ;;  %v1235_v26 = vadd.f32 %v2120_v37, %v2118_v3  ;;  %v2122_v9 = vpop.eup %2121  ;;  %v1181_v21 = vmul.f32 1.442695, %v1074_v58 }
 0x301   : > { %2127 = vpow2.f32 %v1177_v22  ;;  %v2124_v3 = vpop.eup %2123 }
 0x302   : > { %1236 = vadd.xlane.f32.xlu0 %v1235_v26  ;;  %1281 = vadd.xlane.f32.xlu2 %v1280_v5  ;;  %2129 = vpow2.f32 %v1179_v23  ;;  %v1238_v17 = vadd.f32 %v2124_v3, %v2122_v9 }
 0x303   : > { %v2913_v44 = vpop.xlane.xlu1 %1002  ;;  %v2915_v27 = vpop.xlane.xlu2 %954  ;;  %2131 = vpow2.f32 %v1181_v21 }
 0x304   : > { %3646 = vst [vmem:[#allocation81_spill] sm:$0xff] %v2913_v44  ;;  %v1043_v38 = vsub.f32 %v2705_v40, %v2915_v27  ;;  %v1044_v1 = vsub.f32 %v2707_v41, %v2915_v27  ;;  %v2921_v22 = vpop.xlane.xlu0 %957  ;;  %v1075_v59 = vsub.f32 %v2733_v56, %v2913_v44  ;;  %v1076_v43 = vsub.f32 %v2735_v57, %v2913_v44 }
 0x305   : > { %3647 = vst [vmem:[#allocation82_spill] sm:$0xff] %v2915_v27  ;;  %v1045_v30 = vsub.f32 %v2717_v48, %v2921_v22  ;;  %v1046_v58 = vsub.f32 %v2719_v49, %v2921_v22 }
 0x306   : > { %3648 = vst [vmem:[#allocation83_spill] sm:$0xff] %v2921_v22  ;;  %v2126_v37 = vpop.eup %2125  ;;  %v1119_v8 = vmul.f32 1.442695, %v1043_v38  ;;  %v1121_v5 = vmul.f32 1.442695, %v1044_v1 }
 0x307   : > { %v2128_v26 = vpop.eup %2127  ;;  %v1183_v20 = vmul.f32 1.442695, %v1075_v59  ;;  %v1185_v19 = vmul.f32 1.442695, %v1076_v43  ;;  %v1123_v14 = vmul.f32 1.442695, %v1045_v30 }
 0x308   : > { %v1283_v39 = vadd.f32 %v2128_v26, %v2126_v37  ;;  %2133 = vpow2.f32 %v1119_v8  ;;  %v1125_v1 = vmul.f32 1.442695, %v1046_v58  ;;  %v2130_v23 = vpop.eup %2129 }
 0x309   : > { %2135 = vpow2.f32 %v1121_v5  ;;  %v2132_v16 = vpop.eup %2131 }
 0x30a   : > { %1284 = vadd.xlane.f32.xlu0 %v1283_v39  ;;  %1239 = vadd.xlane.f32.xlu2 %v1238_v17  ;;  %2137 = vpow2.f32 %v1183_v20  ;;  %v1286_v9 = vadd.f32 %v2132_v16, %v2130_v23 }
 0x30b   : > { %v2931_v38 = vpop.xlane.xlu2 %1005  ;;  %2139 = vpow2.f32 %v1185_v19 }
 0x30c   : > { %3649 = vst [vmem:[#allocation84_spill] sm:$0xff] %v2931_v38  ;;  %2141 = vpow2.f32 %v1123_v14  ;;  %v1077_v21 = vsub.f32 %v2743_v61, %v2931_v38  ;;  %v1078_v39 = vsub.f32 %v2745_v62, %v2931_v38 }
 0x30d   : > { %2143 = vpow2.f32 %v1125_v1 }
 0x30e   : > { %v2134_v37 = vpop.eup %2133  ;;  %v1187_v20 = vmul.f32 1.442695, %v1077_v21  ;;  %v1189_v26 = vmul.f32 1.442695, %v1078_v39 }
 0x30f   : > { %v2136_v59 = vpop.eup %2135 }
 0x310   : > { %v1241_v3 = vadd.f32 %v2136_v59, %v2134_v37  ;;  %v2138_v30 = vpop.eup %2137  ;;  %2145 = vpow2.f32 %v1187_v20 }
 0x311   : > { %v2140_v19 = vpop.eup %2139  ;;  %2147 = vpow2.f32 %v1189_v26 }
 0x312   : > { %1287 = vadd.xlane.f32.xlu2 %v1286_v9  ;;  %1242 = vadd.xlane.f32.xlu0 %v1241_v3  ;;  %v2142_v5 = vpop.eup %2141  ;;  %v1289_v59 = vadd.f32 %v2140_v19, %v2138_v30 }
 0x313   : > { %v2937_v8 = vpop.xlane.xlu0 %1008  ;;  %v2939_v17 = vpop.xlane.xlu2 %960 }
 0x314   : > { %3650 = vst [vmem:[#allocation85_spill] sm:$0xff] %v2937_v8  ;;  %v1047_v14 = vsub.f32 %v2729_v54, %v2939_v17  ;;  %v1048_v43 = vsub.f32 %v2731_v55, %v2939_v17  ;;  %v2144_v16 = vpop.eup %2143  ;;  %v1079_v23 = vsub.f32 %v2753_v6, %v2937_v8  ;;  %v1080_v37 = vsub.f32 %v2755_v7, %v2937_v8 }
 0x315   : > { %v1244_v21 = vadd.f32 %v2144_v16, %v2142_v5 }
 0x316   : > { %v1127_v58 = vmul.f32 1.442695, %v1047_v14  ;;  %v1129_v1 = vmul.f32 1.442695, %v1048_v43  ;;  %v1191_v3 = vmul.f32 1.442695, %v1079_v23  ;;  %v2146_v43 = vpop.eup %2145 }
 0x317   : > { %v1193_v14 = vmul.f32 1.442695, %v1080_v37 }
 0x318   : > { %2149 = vpow2.f32 %v1127_v58  ;;  %v2148_v58 = vpop.eup %2147 }
 0x319   : > { %2151 = vpow2.f32 %v1129_v1  ;;  %v1292_v23 = vadd.f32 %v2148_v58, %v2146_v43 }
 0x31a   : > { %1245 = vadd.xlane.f32.xlu2 %v1244_v21  ;;  %1290 = vadd.xlane.f32.xlu0 %v1289_v59  ;;  %2153 = vpow2.f32 %v1191_v3 }
 0x31b   : > { %v2949_v39 = vpop.xlane.xlu2 %1011  ;;  %v2951_v9 = vpop.xlane.xlu0 %963  ;;  %2155 = vpow2.f32 %v1193_v14 }
 0x31c   : > { %3651 = vst [vmem:[#allocation86_spill] sm:$0xff] %v2949_v39  ;;  %v1049_v20 = vsub.f32 %v2747_v63, %v2951_v9  ;;  %v1050_v26 = vsub.f32 %v2749_v0, %v2951_v9  ;;  %v1081_v19 = vsub.f32 %v2765_v12, %v2949_v39  ;;  %v1082_v1 = vsub.f32 %v2767_v15, %v2949_v39 }
 0x31e   : > { %v1131_v13 = vmul.f32 1.442695, %v1049_v20  ;;  %v1133_v5 = vmul.f32 1.442695, %v1050_v26  ;;  %v2150_v30 = vpop.eup %2149  ;;  %v1195_v20 = vmul.f32 1.442695, %v1081_v19 }
 0x31f   : > { %v2152_v16 = vpop.eup %2151  ;;  %v1197_v26 = vmul.f32 1.442695, %v1082_v1 }
 0x320   : > { %2157 = vpow2.f32 %v1131_v13  ;;  %v1247_v37 = vadd.f32 %v2152_v16, %v2150_v30  ;;  %v2154_v51 = vpop.eup %2153 }
 0x321   : > { %2159 = vpow2.f32 %v1133_v5  ;;  %v2156_v13 = vpop.eup %2155 }
 0x322   : > { %1293 = vadd.xlane.f32.xlu2 %v1292_v23  ;;  %1248 = vadd.xlane.f32.xlu0 %v1247_v37  ;;  %2161 = vpow2.f32 %v1195_v20  ;;  %v1295_v1 = vadd.f32 %v2156_v13, %v2154_v51 }
 0x323   : > { %v2961_v21 = vpop.xlane.xlu0 %1014  ;;  %v2963_v59 = vpop.xlane.xlu2 %966  ;;  %2163 = vpow2.f32 %v1197_v26 }
 0x324   : > { %v1051_v3 = vsub.f32 %v2761_v10, %v2963_v59  ;;  %v1052_v14 = vsub.f32 %v2763_v11, %v2963_v59  ;;  %v1083_v5 = vsub.f32 %v2777_v34, %v2961_v21  ;;  %v1084_v19 = vsub.f32 %v2779_v35, %v2961_v21 }
 0x326   : > { %v1135_v45 = vmul.f32 1.442695, %v1051_v3  ;;  %v1137_v43 = vmul.f32 1.442695, %v1052_v14  ;;  %v2158_v58 = vpop.eup %2157  ;;  %v1199_v3 = vmul.f32 1.442695, %v1083_v5 }
 0x327   : > { %v2160_v30 = vpop.eup %2159  ;;  %v1201_v14 = vmul.f32 1.442695, %v1084_v19 }
 0x328   : > { %2165 = vpow2.f32 %v1135_v45  ;;  %v1250_v16 = vadd.f32 %v2160_v30, %v2158_v58  ;;  %v2162_v50 = vpop.eup %2161 }
 0x329   : > { %2167 = vpow2.f32 %v1137_v43  ;;  %v2164_v45 = vpop.eup %2163 }
 0x32a   : > { %1251 = vadd.xlane.f32.xlu2 %v1250_v16  ;;  %1296 = vadd.xlane.f32.xlu0 %v1295_v1  ;;  %2169 = vpow2.f32 %v1199_v3  ;;  %v1298_v30 = vadd.f32 %v2164_v45, %v2162_v50 }
 0x32b   : > { %v2973_v23 = vpop.xlane.xlu2 %1017  ;;  %v2975_v37 = vpop.xlane.xlu0 %969  ;;  %2171 = vpow2.f32 %v1201_v14 }
 0x32c   : > { %v1053_v20 = vsub.f32 %v2773_v28, %v2975_v37  ;;  %v1054_v26 = vsub.f32 %v2775_v29, %v2975_v37  ;;  %v1085_v13 = vsub.f32 %v2789_v52, %v2973_v23  ;;  %v1086_v5 = vsub.f32 %v2791_v53, %v2973_v23 }
 0x32e   : > { %v1139_v18 = vmul.f32 1.442695, %v1053_v20  ;;  %v1141_v58 = vmul.f32 1.442695, %v1054_v26  ;;  %v2166_v51 = vpop.eup %2165  ;;  %v1203_v20 = vmul.f32 1.442695, %v1085_v13 }
 0x32f   : > { %v2168_v43 = vpop.eup %2167  ;;  %v1205_v26 = vmul.f32 1.442695, %v1086_v5  ;;  %v3652_v13 = vld [vmem:[#allocation57_spill] sm:$0xff] }
 0x330   : > { %2173 = vpow2.f32 %v1139_v18  ;;  %v1253_v19 = vadd.f32 %v2168_v43, %v2166_v51  ;;  %v2170_v42 = vpop.eup %2169 }
 0x331   : > { %2175 = vpow2.f32 %v1141_v58  ;;  %v2172_v18 = vpop.eup %2171 }
 0x332   : > { %1299 = vadd.xlane.f32.xlu2 %v1298_v30  ;;  %1254 = vadd.xlane.f32.xlu0 %v1253_v19  ;;  %2177 = vpow2.f32 %v1203_v20  ;;  %v1301_v5 = vadd.f32 %v2172_v18, %v2170_v42  ;;  %v3653_v20 = vld [vmem:[#allocation58_spill] sm:$0xff]  ;;  %v3655_v18 = vld [vmem:[#allocation60_spill] sm:$0xff] }
 0x333   : > { %v2985_v16 = vpop.xlane.xlu0 %1020  ;;  %v2987_v1 = vpop.xlane.xlu2 %972  ;;  %2179 = vpow2.f32 %v1205_v26  ;;  %v3654_v26 = vld [vmem:[#allocation59_spill] sm:$0xff] }
 0x334   : > { %v1055_v3 = vsub.f32 %v2785_v46, %v2987_v1  ;;  %v1056_v14 = vsub.f32 %v2787_v47, %v2987_v1  ;;  %v1087_v58 = vsub.f32 %v2797_v60, %v2985_v16  ;;  %v1088_v43 = vsub.f32 %v3652_v13, %v2985_v16 }
 0x336   : > { %v1143_v36 = vmul.f32 1.442695, %v1055_v3  ;;  %v1145_v50 = vmul.f32 1.442695, %v1056_v14  ;;  %v2174_v45 = vpop.eup %2173  ;;  %v1207_v3 = vmul.f32 1.442695, %v1087_v58 }
 0x337   : > { %v2176_v51 = vpop.eup %2175  ;;  %v1209_v25 = vmul.f32 1.442695, %v1088_v43  ;;  %v3656_v58 = vld [vmem:[#allocation61_spill] sm:$0xff] }
 0x338   : > { %2181 = vpow2.f32 %v1143_v36  ;;  %v1256_v30 = vadd.f32 %v2176_v51, %v2174_v45  ;;  %v2178_v4 = vpop.eup %2177 }
 0x339   : > { %2183 = vpow2.f32 %v1145_v50  ;;  %v2180_v36 = vpop.eup %2179 }
 0x33a   : > { %1257 = vadd.xlane.f32.xlu2 %v1256_v30  ;;  %1302 = vadd.xlane.f32.xlu0 %v1301_v5  ;;  %2185 = vpow2.f32 %v1207_v3  ;;  %v1304_v5 = vadd.f32 %v2180_v36, %v2178_v4 }
 0x33b   : > { %v2997_v19 = vpop.xlane.xlu2 %1023  ;;  %v2999_v33 = vpop.xlane.xlu0 %975  ;;  %2187 = vpow2.f32 %v1209_v25  ;;  %v3657_v25 = vld [vmem:[#allocation62_spill] sm:$0xff] }
 0x33c   : > { %v1057_v14 = vsub.f32 %v3653_v20, %v2999_v33  ;;  %v1058_v32 = vsub.f32 %v3654_v26, %v2999_v33  ;;  %v1089_v50 = vsub.f32 %v3655_v18, %v2997_v19  ;;  %v1090_v30 = vsub.f32 %v3656_v58, %v2997_v19 }
 0x33e   : > { %v1147_v13 = vmul.f32 1.442695, %v1057_v14  ;;  %v1149_v45 = vmul.f32 1.442695, %v1058_v32  ;;  %v2182_v42 = vpop.eup %2181  ;;  %v1211_v14 = vmul.f32 1.442695, %v1089_v50 }
 0x33f   : > { %v2184_v51 = vpop.eup %2183  ;;  %v1213_v3 = vmul.f32 1.442695, %v1090_v30  ;;  %v3659_v50 = vld [vmem:[#allocation65_spill] sm:$0xff] }
 0x340   : > { %2189 = vpow2.f32 %v1147_v13  ;;  %v1259_v43 = vadd.f32 %v2184_v51, %v2182_v42  ;;  %v2186_v24 = vpop.eup %2185 }
 0x341   : > { %2191 = vpow2.f32 %v1149_v45  ;;  %v2188_v13 = vpop.eup %2187  ;;  %v3658_v45 = vld [vmem:[#allocation64_spill] sm:$0xff] }
 0x342   : > { %1305 = vadd.xlane.f32.xlu2 %v1304_v5  ;;  %1260 = vadd.xlane.f32.xlu0 %v1259_v43  ;;  %2193 = vpow2.f32 %v1211_v14  ;;  %v1307_v30 = vadd.f32 %v2188_v13, %v2186_v24  ;;  %v3662_v13 = vld [vmem:[#allocation69_spill] sm:$0xff] }
 0x343   : > { %v3009_v20 = vpop.xlane.xlu0 %1026  ;;  %v3011_v26 = vpop.xlane.xlu2 %978  ;;  %2195 = vpow2.f32 %v1213_v3  ;;  %v3661_v3 = vld [vmem:[#allocation67_spill] sm:$0xff] }
 0x344   : > { %v1059_v32 = vsub.f32 %v2817_v2, %v3011_v26  ;;  %v1060_v18 = vsub.f32 %v3657_v25, %v3011_v26  ;;  %v1091_v42 = vsub.f32 %v3658_v45, %v3009_v20  ;;  %v1092_v5 = vsub.f32 %v3659_v50, %v3009_v20 }
 0x346   : > { %v1151_v58 = vmul.f32 1.442695, %v1059_v32  ;;  %v1153_v4 = vmul.f32 1.442695, %v1060_v18  ;;  %v2190_v36 = vpop.eup %2189  ;;  %v1215_v25 = vmul.f32 1.442695, %v1091_v42 }
 0x347   : > { %v2192_v51 = vpop.eup %2191  ;;  %v3660_v32 = vld [vmem:[#allocation66_spill] sm:$0xff]  ;;  %v1217_v18 = vmul.f32 1.442695, %v1092_v5 }
 0x348   : > { %2197 = vpow2.f32 %v1151_v58  ;;  %v1262_v43 = vadd.f32 %v2192_v51, %v2190_v36  ;;  %v2194_v57 = vpop.eup %2193  ;;  %v3663_v51 = vld [vmem:[#allocation70_spill] sm:$0xff] }
 0x349   : > { %2199 = vpow2.f32 %v1153_v4  ;;  %v2196_v58 = vpop.eup %2195 }
 0x34a   : > { %1263 = vadd.xlane.f32.xlu2 %v1262_v43  ;;  %1308 = vadd.xlane.f32.xlu0 %v1307_v30  ;;  %2201 = vpow2.f32 %v1215_v25  ;;  %v1310_v5 = vadd.f32 %v2196_v58, %v2194_v57 }
 0x34b   : > { %v3021_v31 = vpop.xlane.xlu0 %981  ;;  %v3025_v62 = vpop.xlane.xlu2 %1029  ;;  %2203 = vpow2.f32 %v1217_v18 }
 0x34c   : > { %v1061_v14 = vsub.f32 %v3660_v32, %v3021_v31  ;;  %v1062_v45 = vsub.f32 %v3661_v3, %v3021_v31  ;;  %v1093_v4 = vsub.f32 %v3662_v13, %v3025_v62  ;;  %v1094_v43 = vsub.f32 %v3663_v51, %v3025_v62 }
 0x34e   : > { %v1155_v50 = vmul.f32 1.442695, %v1061_v14  ;;  %v1157_v36 = vmul.f32 1.442695, %v1062_v45  ;;  %v2198_v24 = vpop.eup %2197  ;;  %v1219_v3 = vmul.f32 1.442695, %v1093_v4 }
 0x34f   : > { %v2200_v42 = vpop.eup %2199  ;;  %v1221_v14 = vmul.f32 1.442695, %v1094_v43 }
 0x350   : > { %2205 = vpow2.f32 %v1155_v50  ;;  %v1265_v30 = vadd.f32 %v2200_v42, %v2198_v24  ;;  %v2202_v45 = vpop.eup %2201 }
 0x351   : > { %2207 = vpow2.f32 %v1157_v36  ;;  %v2204_v25 = vpop.eup %2203 }
 0x352   : > { %1311 = vadd.xlane.f32.xlu2 %v1310_v5  ;;  %1266 = vadd.xlane.f32.xlu0 %v1265_v30  ;;  %2209 = vpow2.f32 %v1219_v3  ;;  %v1313_v18 = vadd.f32 %v2204_v25, %v2202_v45 }
 0x353   : > { %v3033_v32 = vpop.xlane.xlu0 %1224  ;;  %2211 = vpow2.f32 %v1221_v14 }
 0x354   : > { %3664 = vst [vmem:[#allocation87_spill] sm:$0xff] %v3033_v32 }
 0x356   : > { %v2206_v61 = vpop.eup %2205 }
 0x357   : > { %v2208_v13 = vpop.eup %2207 }
 0x358   : > { %v1268_v38 = vadd.f32 %v2208_v13, %v2206_v61  ;;  %v2210_v57 = vpop.eup %2209 }
 0x359   : > { %v2212_v50 = vpop.eup %2211 }
 0x35a   : > { %1314 = vadd.xlane.f32.xlu0 %v1313_v18  ;;  %1269 = vadd.xlane.f32.xlu2 %v1268_v38  ;;  %v1316_v36 = vadd.f32 %v2212_v50, %v2210_v57 }
 0x35b   : > { %v3035_v56 = vpop.xlane.xlu0 %1272 }
 0x35c   : > { %3665 = vst [vmem:[#allocation88_spill] sm:$0xff] %v3035_v56 }
 0x35d   : > { %v3037_v58 = vpop.xlane.xlu2 %1227 }
 0x35e   : > { %3666 = vst [vmem:[#allocation89_spill] sm:$0xff] %v3037_v58 }
 0x362   : > { %1317 = vadd.xlane.f32.xlu2 %v1316_v36 }
 0x365   : > { %v3039_v24 = vpop.xlane.xlu0 %1230  ;;  %v3041_v4 = vpop.xlane.xlu2 %1275 }
 0x366   : > { %3667 = vst [vmem:[#allocation90_spill] sm:$0xff] %v3039_v24 }
 0x367   : > { %3668 = vst [vmem:[#allocation91_spill] sm:$0xff] %v3041_v4 }
 0x36d   : > { %v3043_v42 = vpop.xlane.xlu0 %1278  ;;  %v3045_v51 = vpop.xlane.xlu2 %1233 }
 0x36e   : > { %3669 = vst [vmem:[#allocation92_spill] sm:$0xff] %v3043_v42 }
 0x36f   : > { %3670 = vst [vmem:[#allocation93_spill] sm:$0xff] %v3045_v51 }
 0x375   : > { %v3047_v43 = vpop.xlane.xlu0 %1236  ;;  %v3051_v38 = vpop.xlane.xlu2 %1281 }
 0x376   : > { %3671 = vst [vmem:[#allocation94_spill] sm:$0xff] %v3047_v43  ;;  %v1319_v61 = vmin.f32 %v3033_v32, %v3047_v43 }
 0x37d   : > { %v3053_v5 = vpop.xlane.xlu0 %1284  ;;  %v3055_v30 = vpop.xlane.xlu2 %1239 }
 0x37e   : > { %3672 = vst [vmem:[#allocation95_spill] sm:$0xff] %v3053_v5  ;;  %v1320_v3 = vmin.f32 %v3037_v58, %v3055_v30 }
 0x37f   : > { %3673 = vst [vmem:[#allocation96_spill] sm:$0xff] %v3055_v30 }
 0x385   : > { %v3059_v14 = vpop.xlane.xlu2 %1287  ;;  %v3061_v45 = vpop.xlane.xlu0 %1242 }
 0x386   : > { %3674 = vst [vmem:[#allocation97_spill] sm:$0xff] %v3059_v14  ;;  %v1321_v39 = vmin.f32 %v3039_v24, %v3061_v45 }
 0x38d   : > { %v3063_v25 = vpop.xlane.xlu2 %1245  ;;  %v3065_v13 = vpop.xlane.xlu0 %1290 }
 0x395   : > { %v3067_v18 = vpop.xlane.xlu2 %1293  ;;  %v3069_v57 = vpop.xlane.xlu0 %1248 }
 0x396   : > { %v1323_v41 = vmin.f32 %v1319_v61, %v3069_v57 }
 0x39d   : > { %v3071_v50 = vpop.xlane.xlu2 %1251  ;;  %v3073_v36 = vpop.xlane.xlu0 %1296 }
 0x39e   : > { %v1324_v43 = vmin.f32 %v1320_v3, %v3071_v50 }
 0x3a5   : > { %v3075_v32 = vpop.xlane.xlu2 %1299  ;;  %v3077_v44 = vpop.xlane.xlu0 %1254 }
 0x3ad   : > { %v3079_v58 = vpop.xlane.xlu2 %1257  ;;  %v3081_v49 = vpop.xlane.xlu0 %1302 }
 0x3b5   : > { %v3084_v48 = vpop.xlane.xlu2 %1305  ;;  %v3086_v22 = vpop.xlane.xlu0 %1260 }
 0x3b6   : > { %v1327_v30 = vmin.f32 %v1323_v41, %v3086_v22 }
 0x3b8   : > { %v1331_v40 = vmin.f32 %v1327_v30, %v3035_v56  ;;  %v1325_v30 = vmin.f32 %v1321_v39, %v3077_v44 }
 0x3ba   : > { %v1335_v27 = vmin.f32 %v1331_v40, %v3053_v5 }
 0x3bc   : > { %v1339_v6 = vmin.f32 %v1335_v27, %v3073_v36 }
 0x3bd   : > { %v3092_v15 = vpop.xlane.xlu2 %1263  ;;  %v3094_v7 = vpop.xlane.xlu0 %1308 }
 0x3be   : > { %v1328_v12 = vmin.f32 %v1324_v43, %v3092_v15  ;;  %v1343_v5 = vmin.f32 %v1339_v6, %v3094_v7 }
 0x3c0   : > { %v1332_v61 = vmin.f32 %v1328_v12, %v3041_v4  ;;  %v1322_v4 = vmin.f32 %v3045_v51, %v3063_v25 }
 0x3c2   : > { %v1336_v41 = vmin.f32 %v1332_v61, %v3059_v14  ;;  %v1326_v61 = vmin.f32 %v1322_v4, %v3079_v58 }
 0x3c4   : > { %v1340_v40 = vmin.f32 %v1336_v41, %v3075_v32 }
 0x3c5   : > { %v3104_v3 = vpop.xlane.xlu2 %1311  ;;  %v1267_v56 = vpop.xlane.xlu0 %1266 }
 0x3c6   : > { %v1344_v43 = vmin.f32 %v1340_v40, %v3104_v3  ;;  %v1329_v8 = vmin.f32 %v1325_v30, %v1267_v56 }
 0x3c8   : > { %v1347_v12 = vmin.f32 %v1343_v5, %v1344_v43  ;;  %v1333_v27 = vmin.f32 %v1329_v8, %v3043_v42 }
 0x3ca   : > { %v1337_v41 = vmin.f32 %v1333_v27, %v3065_v13 }
 0x3cc   : > { %v1341_v0 = vmin.f32 %v1337_v41, %v3081_v49 }
 0x3cd   : > { %v1270_v24 = vpop.xlane.xlu2 %1269  ;;  %v1315_v40 = vpop.xlane.xlu0 %1314 }
 0x3ce   : > { %v1330_v39 = vmin.f32 %v1326_v61, %v1270_v24  ;;  %v1345_v43 = vmin.f32 %v1341_v0, %v1315_v40 }
 0x3d0   : > { %v1334_v14 = vmin.f32 %v1330_v39, %v3051_v38 }
 0x3d2   : > { %v1338_v6 = vmin.f32 %v1334_v14, %v3067_v18 }
 0x3d4   : > { %v1342_v5 = vmin.f32 %v1338_v6, %v3084_v48 }
 0x3d5   : > { %v1318_v30 = vpop.xlane.xlu2 %1317 }
 0x3d6   : > { %v1346_v51 = vmin.f32 %v1342_v5, %v1318_v30 }
 0x3d8   : > { %v1348_v8 = vmin.f32 %v1345_v43, %v1346_v51 }
 0x3da   : > { %v1349_v42 = vmin.f32 %v1347_v12, %v1348_v8 }
 0x3dc   : > { %v1350_v4 = vrot.slane %v1349_v42, 4 }
 0x3de   : > { %v1351_v55 = vmin.f32 %v1349_v42, %v1350_v4 }
 0x3e0   : > { %v1352_v61 = vrot.slane %v1351_v55, 2 }
 0x3e2   : > { %v1353_v63 = vmin.f32 %v1351_v55, %v1352_v61 }
 0x3e4   : > { %v1354_v27 = vrot.slane %v1353_v63, 1 }
 0x3e6   : > { %v1355_v39 = vmin.f32 %v1353_v63, %v1354_v27 }
 0x3e8   : > { %1357 = vst.msk [vmem:[#allocation4] sm:$0x1] %vm1356_vm3, %v1355_v39 }
 0x3ef   : > { %v1358_v41 = vld [vmem:[#allocation4] sm:$0x1] }
 0x3f0   : > { %2013 = vpush %v1358_v41 }
 0x421   : > { %s3117_s25 = spop %2013 }
 0x422   : > { %p1360_p4 = scmp.lt.f32.partialorder %s3117_s25, 2.0 }
 0x423   : > { %2213 = vrcp.f32 (%p1360_p4), %v1267_v56  ;;  %vm1378_vm4 = vcmp.lt.f32.partialorder (%p1360_p4), %v1267_v56, 2.0  ;;  %vm1379_vm5 = vcmp.lt.f32.partialorder (%p1360_p4), %v1270_v24, 2.0  ;;  %vm1488_vm6 = vcmp.ge.f32.partialorder (%p1360_p4), %v2817_v2, %v3011_v26  ;;  %v3675_v55 = vld [vmem:[#allocation66_spill] sm:$0xff] (%p1360_p4)  ;;  %v3677_v0 = vld [vmem:[#allocation67_spill] sm:$0xff] (%p1360_p4)  ;;  %v3678_v51 = vld [vmem:[#allocation64_spill] sm:$0xff] (%p1360_p4)  ;;  %s1688_s23 = sld [smem:[#allocation5]] (%p1360_p4) }
 0x424   : > { %1363 = sbr.rel (!%p1360_p4) target bundleno = 1282 (0x502), region = 64  ;;  %2215 = vrcp.f32 (%p1360_p4), %v1270_v24  ;;  %vm1490_vm7 = vcmp.ge.f32.partialorder (%p1360_p4), %v3675_v55, %v3021_v31  ;;  %v3676_v63 = vld [vmem:[#allocation62_spill] sm:$0xff] (%p1360_p4)  ;;  %vm1491_vm9 = vcmp.ge.f32.partialorder (%p1360_p4), %v3677_v0, %v3021_v31  ;;  %vm1394_vm10 = vcmp.lt.f32.partialorder (%p1360_p4), %v1315_v40, 2.0  ;;  %v3679_v2 = vld [vmem:[#allocation69_spill] sm:$0xff] (%p1360_p4)  ;;  %v3715_v31 = vld [vmem:[#allocation39_spill] sm:$0xff] (%p1360_p4) }
 0x425   : > { %2217 = vrcp.f32 (%p1360_p4), %v1315_v40  ;;  %vm1489_vm8 = vcmp.ge.f32.partialorder (%p1360_p4), %v3676_v63, %v3011_v26  ;;  %vm1395_vm11 = vcmp.lt.f32.partialorder (%p1360_p4), %v1318_v30, 2.0  ;;  %vm1520_vm12 = vcmp.ge.f32.partialorder (%p1360_p4), %v3678_v51, %v3009_v20  ;;  %vm3140_vm14 = vmpackc.low (%p1360_p4), %vm1490_vm7, %vm1488_vm6  ;;  %v3682_v5 = vld [vmem:[#allocation65_spill] sm:$0xff] (%p1360_p4)  ;;  %v3683_v43 = vld [vmem:[#allocation70_spill] sm:$0xff] (%p1360_p4) }
 0x426   : > { %2219 = vrcp.f32 (%p1360_p4), %v1318_v30  ;;  %vm1522_vm13 = vcmp.ge.f32.partialorder (%p1360_p4), %v3679_v2, %v3025_v62  ;;  %vm1521_vm15 = vcmp.ge.f32.partialorder (%p1360_p4), %v3682_v5, %v3009_v20  ;;  %vm1523_vm0 = vcmp.ge.f32.partialorder (%p1360_p4), %v3683_v43, %v3025_v62  ;;  %vm1930_vm1 = vmpackc.low (%p1360_p4), %vm1491_vm9, %vm1489_vm8  ;;  %v3688_v39 = vld [vmem:[#allocation58_spill] sm:$0xff] (%p1360_p4)  ;;  %v3690_v63 = vld [vmem:[#allocation60_spill] sm:$0xff] (%p1360_p4) }
 0x427   : > { %2221 = vrcp.f32 (%p1360_p4), %v3086_v22  ;;  %vm3160_vm2 = vmpackc.low (%p1360_p4), %vm1522_vm13, %vm1520_vm12  ;;  %vm1376_vm3 = vcmp.lt.f32.partialorder (%p1360_p4), %v3086_v22, 2.0  ;;  %vm1484_vm6 = vcmp.ge.f32.partialorder (%p1360_p4), %v2785_v46, %v2987_v1  ;;  %vm1392_vm7 = vcmp.lt.f32.partialorder (%p1360_p4), %v3094_v7, 2.0  ;;  %v3727_v2 = vld [vmem:[#allocation77_spill] sm:$0xff] (%p1360_p4)  ;;  %v3747_v43 = vld [vmem:[#allocation74_spill] sm:$0xff] (%p1360_p4) }
 0x428   : > { %2223 = vrcp.f32 (%p1360_p4), %v3092_v15  ;;  %vm1393_vm8 = vcmp.lt.f32.partialorder (%p1360_p4), %v3104_v3, 2.0  ;;  %vm1486_vm9 = vcmp.ge.f32.partialorder (%p1360_p4), %v3688_v39, %v2999_v33  ;;  %vm1516_vm12 = vcmp.ge.f32.partialorder (%p1360_p4), %v2797_v60, %v2985_v16  ;;  %v3721_v39 = vld [vmem:[#allocation49_spill] sm:$0xff] (%p1360_p4) }
 0x429   : > { %v2214_v42 = vpop.eup %2213  ;;  %2225 = vrcp.f32 %v3094_v7  ;;  %v3689_v7 = vld [vmem:[#allocation59_spill] sm:$0xff]  ;;  %vm1518_vm13 = vcmp.ge.f32.partialorder %v3690_v63, %v2997_v19 }
 0x42a   : > { %v2216_v14 = vpop.eup %2215  ;;  %v1442_v12 = vsel %vm1378_vm4, %v2214_v42, 0.0  ;;  %2227 = vrcp.f32 %v3104_v3  ;;  %vm1377_vm4 = vcmp.lt.f32.partialorder %v3092_v15, 2.0 }
 0x42b   : > { %v2218_v8 = vpop.eup %2217  ;;  %v1443_v4 = vsel %vm1379_vm5, %v2216_v14, 0.0  ;;  %vm3167_vm5 = vmpackc.low %vm1523_vm0, %vm1521_vm15  ;;  %2229 = vrcp.f32 %v3077_v44 }
 0x42c   : > { %v2220_v56 = vpop.eup %2219  ;;  %v1907_v61 = vpack.c.bf16 %v1443_v4, %v1442_v12  ;;  %v1458_v27 = vsel %vm1394_vm10, %v2218_v8, 0.0  ;;  %2231 = vrcp.f32 %v3079_v58  ;;  %vm1485_vm10 = vcmp.ge.f32.partialorder %v2787_v47, %v2987_v1  ;;  %v3691_v47 = vld [vmem:[#allocation57_spill] sm:$0xff]  ;;  %v3704_v12 = vld [vmem:[#allocation54_spill] sm:$0xff] }
 0x42d   : > { %v2222_v26 = vpop.eup %2221  ;;  %v1459_v24 = vsel %vm1395_vm11, %v2220_v56, 0.0  ;;  %2233 = vrcp.f32 %v3081_v49  ;;  %vm1487_vm11 = vcmp.ge.f32.partialorder %v3689_v7, %v2999_v33  ;;  %vm1517_vm15 = vcmp.ge.f32.partialorder %v3691_v47, %v2985_v16  ;;  %v3692_v33 = vld [vmem:[#allocation61_spill] sm:$0xff]  ;;  %v3709_v56 = vld [vmem:[#allocation82_spill] sm:$0xff]  ;;  %v3722_v7 = vld [vmem:[#allocation48_spill] sm:$0xff] }
 0x42e   : > { %v2224_v20 = vpop.eup %2223  ;;  %1908 = vmatpush.bf16.xpose.msk.msra.mxu0 %vm3140_vm14, %v1907_v61  ;;  %1932 = vmatpush.bf16.xpose.msk.msra.mxu1 %vm1930_vm1, %v1907_v61  ;;  %v1955_v22 = vpack.c.bf16 %v1459_v24, %v1458_v27  ;;  %v1440_v40 = vsel %vm1376_vm3, %v2222_v26, 0.0  ;;  %2235 = vrcp.f32 %v3084_v48  ;;  %vm1909_vm14 = vmpackc.low %vm1486_vm9, %vm1484_vm6  ;;  %vm1519_vm0 = vcmp.ge.f32.partialorder %v3692_v33, %v2997_v19  ;;  %v3710_v61 = vld [vmem:[#allocation38_spill] sm:$0xff]  ;;  %v3711_v27 = vld [vmem:[#allocation96_spill] sm:$0xff] }
 0x42f   : > { %v2226_v15 = vpop.eup %2225  ;;  %v1441_v30 = vsel %vm1377_vm4, %v2224_v20, 0.0  ;;  %vm1933_vm1 = vmpackc.low %vm1487_vm11, %vm1485_vm10  ;;  %vm1374_vm3 = vcmp.lt.f32.partialorder %v3077_v44, 2.0  ;;  %vm1375_vm4 = vcmp.lt.f32.partialorder %v3079_v58, 2.0  ;;  %2237 = vrcp.f32 %v3069_v57  ;;  %v3700_v58 = vld [vmem:[#allocation85_spill] sm:$0xff]  ;;  %v3712_v26 = vld [vmem:[#allocation83_spill] sm:$0xff] }
 0x430   : > { %v2228_v41 = vpop.eup %2227  ;;  %1956 = vmatpush.bf16.xpose.msk.msra.mxu2 %vm3160_vm2, %v1955_v22  ;;  %1980 = vmatpush.bf16.xpose.msk.msra.mxu3 %vm3167_vm5, %v1955_v22  ;;  %v1456_v3 = vsel %vm1392_vm7, %v2226_v15, 0.0  ;;  %v1910_v0 = vpack.c.bf16 %v1441_v30, %v1440_v40  ;;  %vm3202_vm2 = vmpackc.low %vm1518_vm13, %vm1516_vm12  ;;  %vm1480_vm6 = vcmp.ge.f32.partialorder %v2761_v10, %v2963_v59  ;;  %vm1390_vm7 = vcmp.lt.f32.partialorder %v3081_v49, 2.0  ;;  %v3714_v24 = vld [vmem:[#allocation95_spill] sm:$0xff]  ;;  %v3718_v15 = vld [vmem:[#allocation81_spill] sm:$0xff] }
 0x431   : > { %v1457_v55 = vsel %vm1393_vm8, %v2228_v41, 0.0  ;;  %v2230_v42 = vpop.eup %2229  ;;  %vm1981_vm5 = vmpackc.low %vm1519_vm0, %vm1517_vm15  ;;  %vm1391_vm8 = vcmp.lt.f32.partialorder %v3084_v48, 2.0  ;;  %2239 = vrcp.f32 %v3071_v50  ;;  %vm1482_vm9 = vcmp.ge.f32.partialorder %v2773_v28, %v2975_v37  ;;  %v3719_v40 = vld [vmem:[#allocation47_spill] sm:$0xff]  ;;  %v3720_v30 = vld [vmem:[#allocation84_spill] sm:$0xff] }
 0x432   : > { %v2232_v51 = vpop.eup %2231  ;;  %v1958_v60 = vpack.c.bf16 %v1457_v55, %v1456_v3  ;;  %v1438_v1 = vsel %vm1374_vm3, %v2230_v42, 0.0  ;;  %2241 = vrcp.f32 %v3073_v36  ;;  %vm1481_vm10 = vcmp.ge.f32.partialorder %v2763_v11, %v2963_v59  ;;  %v3698_v59 = vld [vmem:[#allocation46_spill] sm:$0xff] }
 0x433   : > { %v2234_v46 = vpop.eup %2233  ;;  %v1439_v44 = vsel %vm1375_vm4, %v2232_v51, 0.0  ;;  %vm1483_vm11 = vcmp.ge.f32.partialorder %v2775_v29, %v2975_v37  ;;  %2243 = vrcp.f32 %v3075_v32  ;;  %vm1512_vm12 = vcmp.ge.f32.partialorder %v2777_v34, %v2961_v21  ;;  %v3723_v3 = vld [vmem:[#allocation50_spill] sm:$0xff] }
 0x434   : > { %v2236_v16 = vpop.eup %2235  ;;  %v1454_v48 = vsel %vm1390_vm7, %v2234_v46, 0.0  ;;  %vm1514_vm13 = vcmp.ge.f32.partialorder %v2789_v52, %v2973_v23  ;;  %v1913_v28 = vpack.c.bf16 %v1439_v44, %v1438_v1  ;;  %vm1513_vm15 = vcmp.ge.f32.partialorder %v2779_v35, %v2961_v21  ;;  %v3697_v21 = vld [vmem:[#allocation51_spill] sm:$0xff]  ;;  %v3726_v42 = vld [vmem:[#allocation90_spill] sm:$0xff]  ;;  %v3729_v46 = vld [vmem:[#allocation93_spill] sm:$0xff] }
 0x435   : > { %v1455_v49 = vsel %vm1391_vm8, %v2236_v16, 0.0  ;;  %vm1515_vm0 = vcmp.ge.f32.partialorder %v2791_v53, %v2973_v23  ;;  %v2238_v11 = vpop.eup %2237  ;;  %vm1372_vm3 = vcmp.lt.f32.partialorder %v3069_v57, 2.0  ;;  %vm1373_vm4 = vcmp.lt.f32.partialorder %v3071_v50, 2.0  ;;  %v3699_v23 = vld [vmem:[#allocation52_spill] sm:$0xff]  ;;  %v3701_v57 = vld [vmem:[#allocation53_spill] sm:$0xff]  ;;  %v3702_v50 = vld [vmem:[#allocation86_spill] sm:$0xff] }
 0x436   : > { %1911 = vmatpush.bf16.xpose.msk.msra.mxu0 %vm1909_vm14, %v1910_v0  ;;  %1935 = vmatpush.bf16.xpose.msk.msra.mxu1 %vm1933_vm1, %v1910_v0  ;;  %vm1912_vm14 = vmpackc.low %vm1482_vm9, %vm1480_vm6  ;;  %v1961_v34 = vpack.c.bf16 %v1455_v49, %v1454_v48  ;;  %2245 = vrcp.f32 %v3061_v45  ;;  %vm1476_vm6 = vcmp.ge.f32.partialorder %v2729_v54, %v2939_v17  ;;  %vm1388_vm7 = vcmp.lt.f32.partialorder %v3073_v36, 2.0  ;;  %v3703_v36 = vld [vmem:[#allocation55_spill] sm:$0xff]  ;;  %v3730_v44 = vld [vmem:[#allocation78_spill] sm:$0xff] }
 0x437   : > { %vm1936_vm1 = vmpackc.low %vm1483_vm11, %vm1481_vm10  ;;  %v2240_v29 = vpop.eup %2239  ;;  %vm1389_vm8 = vcmp.lt.f32.partialorder %v3075_v32, 2.0  ;;  %2247 = vrcp.f32 %v3063_v25  ;;  %v1436_v52 = vsel %vm1372_vm3, %v2238_v11, 0.0  ;;  %vm1478_vm9 = vcmp.ge.f32.partialorder %v3697_v21, %v2951_v9  ;;  %v3731_v48 = vld [vmem:[#allocation34_spill] sm:$0xff]  ;;  %v3732_v49 = vld [vmem:[#allocation92_spill] sm:$0xff] }
 0x438   : > { %1959 = vmatpush.bf16.xpose.msk.msra.mxu2 %vm3202_vm2, %v1958_v60  ;;  %1983 = vmatpush.bf16.xpose.msk.msra.mxu3 %vm1981_vm5, %v1958_v60  ;;  %vm3235_vm2 = vmpackc.low %vm1514_vm13, %vm1512_vm12  ;;  %v2242_v10 = vpop.eup %2241  ;;  %v1437_v53 = vsel %vm1373_vm4, %v2240_v29, 0.0  ;;  %2249 = vrcp.f32 %v3065_v13  ;;  %vm1477_vm10 = vcmp.ge.f32.partialorder %v3698_v59, %v2939_v17  ;;  %vm1479_vm11 = vcmp.ge.f32.partialorder %v3699_v23, %v2951_v9  ;;  %v3705_v9 = vld [vmem:[#allocation56_spill] sm:$0xff]  ;;  %v3708_v17 = vld [vmem:[#allocation94_spill] sm:$0xff] }
 0x439   : > { %vm1984_vm5 = vmpackc.low %vm1515_vm0, %vm1513_vm15  ;;  %v2244_v35 = vpop.eup %2243  ;;  %2251 = vrcp.f32 %v3067_v18  ;;  %v1452_v19 = vsel %vm1388_vm7, %v2242_v10, 0.0  ;;  %vm1508_vm12 = vcmp.ge.f32.partialorder %v3701_v57, %v3700_v58  ;;  %vm1510_vm13 = vcmp.ge.f32.partialorder %v3703_v36, %v3702_v50  ;;  %v3728_v60 = vld [vmem:[#allocation28_spill] sm:$0xff]  ;;  %v3734_v11 = vld [vmem:[#allocation35_spill] sm:$0xff] }
 0x43a   : > { %v1453_v32 = vsel %vm1389_vm8, %v2244_v35, 0.0  ;;  %v1916_v14 = vpack.c.bf16 %v1437_v53, %v1436_v52  ;;  %vm1509_vm15 = vcmp.ge.f32.partialorder %v3704_v12, %v3700_v58  ;;  %vm1511_vm0 = vcmp.ge.f32.partialorder %v3705_v9, %v3702_v50  ;;  %v3736_v10 = vld [vmem:[#allocation40_spill] sm:$0xff]  ;;  %v3739_v21 = vld [vmem:[#allocation41_spill] sm:$0xff]  ;;  %v3743_v50 = vld [vmem:[#allocation87_spill] sm:$0xff] }
 0x43b   : > { %v1964_v8 = vpack.c.bf16 %v1453_v32, %v1452_v19  ;;  %vm1370_vm3 = vcmp.lt.f32.partialorder %v3061_v45, 2.0  ;;  %vm1371_vm4 = vcmp.lt.f32.partialorder %v3063_v25, 2.0  ;;  %2253 = vrcp.f32 %v3708_v17  ;;  %v3713_v25 = vld [vmem:[#allocation42_spill] sm:$0xff]  ;;  %v3737_v35 = vld [vmem:[#allocation80_spill] sm:$0xff]  ;;  %v3740_v59 = vld [vmem:[#allocation45_spill] sm:$0xff] }
 0x43c   : > { %v2246_v6 = vpop.eup %2245  ;;  %vm1386_vm7 = vcmp.lt.f32.partialorder %v3065_v13, 2.0  ;;  %vm1387_vm8 = vcmp.lt.f32.partialorder %v3067_v18, 2.0  ;;  %2255 = vrcp.f32 %v3711_v27  ;;  %v3716_v13 = vld [vmem:[#allocation43_spill] sm:$0xff]  ;;  %v3717_v18 = vld [vmem:[#allocation97_spill] sm:$0xff]  ;;  %v3738_v52 = vld [vmem:[#allocation44_spill] sm:$0xff] }
 0x43d   : > { %v2248_v5 = vpop.eup %2247  ;;  %v1434_v62 = vsel %vm1370_vm3, %v2246_v6, 0.0  ;;  %2257 = vrcp.f32 %v3714_v24  ;;  %vm1368_vm3 = vcmp.lt.f32.partialorder %v3708_v17, 2.0  ;;  %v3745_v12 = vld [vmem:[#allocation22_spill] sm:$0xff]  ;;  %v3746_v9 = vld [vmem:[#allocation89_spill] sm:$0xff]  ;;  %v3750_v17 = vld [vmem:[#allocation23_spill] sm:$0xff] }
 0x43e   : > { %1914 = vmatpush.bf16.xpose.msk.msra.mxu0 %vm1912_vm14, %v1913_v28  ;;  %1938 = vmatpush.bf16.xpose.msk.msra.mxu1 %vm1936_vm1, %v1913_v28  ;;  %vm1915_vm14 = vmpackc.low %vm1478_vm9, %vm1476_vm6  ;;  %v2250_v54 = vpop.eup %2249  ;;  %vm1472_vm6 = vcmp.ge.f32.partialorder %v3710_v61, %v3709_v56  ;;  %v1435_v45 = vsel %vm1371_vm4, %v2248_v5, 0.0  ;;  %vm1474_vm9 = vcmp.ge.f32.partialorder %v3713_v25, %v3712_v26  ;;  %2259 = vrcp.f32 %v3717_v18  ;;  %v3733_v28 = vld [vmem:[#allocation29_spill] sm:$0xff] }
 0x43f   : > { %vm1939_vm1 = vmpackc.low %vm1479_vm11, %vm1477_vm10  ;;  %v2252_v4 = vpop.eup %2251  ;;  %vm1473_vm10 = vcmp.ge.f32.partialorder %v3715_v31, %v3709_v56  ;;  %vm1475_vm11 = vcmp.ge.f32.partialorder %v3716_v13, %v3712_v26  ;;  %v1450_v20 = vsel %vm1386_vm7, %v2250_v54, 0.0  ;;  %v1919_v41 = vpack.c.bf16 %v1435_v45, %v1434_v62  ;;  %v3749_v54 = vld [vmem:[#allocation88_spill] sm:$0xff]  ;;  %v3758_v31 = vld [vmem:[#allocation37_spill] sm:$0xff] }
 0x440   : > { %1962 = vmatpush.bf16.xpose.msk.msra.mxu2 %vm3235_vm2, %v1961_v34  ;;  %1986 = vmatpush.bf16.xpose.msk.msra.mxu3 %vm1984_vm5, %v1961_v34  ;;  %vm3268_vm2 = vmpackc.low %vm1510_vm13, %vm1508_vm12  ;;  %v1451_v22 = vsel %vm1387_vm8, %v2252_v4, 0.0  ;;  %vm1504_vm12 = vcmp.ge.f32.partialorder %v3719_v40, %v3718_v15  ;;  %vm1506_vm13 = vcmp.ge.f32.partialorder %v3721_v39, %v3720_v30  ;;  %vm1369_vm4 = vcmp.lt.f32.partialorder %v3711_v27, 2.0  ;;  %v3735_v34 = vld [vmem:[#allocation79_spill] sm:$0xff]  ;;  %v3751_v4 = vld [vmem:[#allocation25_spill] sm:$0xff] }
 0x441   : > { %vm1987_vm5 = vmpackc.low %vm1511_vm0, %vm1509_vm15  ;;  %vm1505_vm15 = vcmp.ge.f32.partialorder %v3722_v7, %v3718_v15  ;;  %vm1507_vm0 = vcmp.ge.f32.partialorder %v3723_v3, %v3720_v30  ;;  %v2254_v55 = vpop.eup %2253  ;;  %v1967_v47 = vpack.c.bf16 %v1451_v22, %v1450_v20  ;;  %2261 = vrcp.f32 %v3726_v42  ;;  %v3753_v27 = vld [vmem:[#allocation75_spill] sm:$0xff]  ;;  %v3754_v62 = vld [vmem:[#allocation32_spill] sm:$0xff] }
 0x442   : > { %v2256_v63 = vpop.eup %2255  ;;  %vm1384_vm7 = vcmp.lt.f32.partialorder %v3714_v24, 2.0  ;;  %vm1385_vm8 = vcmp.lt.f32.partialorder %v3717_v18, 2.0  ;;  %2263 = vrcp.f32 %v3729_v46  ;;  %v1432_v16 = vsel %vm1368_vm3, %v2254_v55, 0.0  ;;  %v3755_v45 = vld [vmem:[#allocation76_spill] sm:$0xff]  ;;  %v3757_v24 = vld [vmem:[#allocation33_spill] sm:$0xff]  ;;  %v3759_v39 = vld [vmem:[#allocation63_spill] sm:$0xff] }
 0x443   : > { %v2258_v33 = vpop.eup %2257  ;;  %v1433_v1 = vsel %vm1369_vm4, %v2256_v63, 0.0  ;;  %2265 = vrcp.f32 %v3732_v49  ;;  %vm1366_vm3 = vcmp.lt.f32.partialorder %v3726_v42, 2.0  ;;  %vm1367_vm4 = vcmp.lt.f32.partialorder %v3729_v46, 2.0  ;;  %v3756_v26 = vld [vmem:[#allocation36_spill] sm:$0xff]  ;;  %v3763_v55 = vld [vmem:[#allocation19_spill] sm:$0xff]  ;;  %v3764_v63 = vld [vmem:[#allocation21_spill] sm:$0xff] }
 0x444   : > { %v2260_v51 = vpop.eup %2259  ;;  %2267 = vrcp.f32 %v3051_v38  ;;  %v1448_v29 = vsel %vm1384_vm7, %v2258_v33, 0.0  ;;  %v1922_v53 = vpack.c.bf16 %v1433_v1, %v1432_v16  ;;  %vm1382_vm7 = vcmp.lt.f32.partialorder %v3732_v49, 2.0  ;;  %v3761_v7 = vld [vmem:[#allocation72_spill] sm:$0xff]  ;;  %v3766_v42 = vld [vmem:[#allocation26_spill] sm:$0xff]  ;;  %v3769_v46 = vld [vmem:[#allocation27_spill] sm:$0xff] }
 0x445   : > { %v1449_v37 = vsel %vm1385_vm8, %v2260_v51, 0.0  ;;  %2269 = vrcp.f32 %v3743_v50  ;;  %vm1383_vm8 = vcmp.lt.f32.partialorder %v3051_v38, 2.0  ;;  %v3752_v38 = vld [vmem:[#allocation91_spill] sm:$0xff]  ;;  %v3762_v3 = vld [vmem:[#allocation20_spill] sm:$0xff] }
 0x446   : > { %1917 = vmatpush.bf16.xpose.msk.msra.mxu0 %vm1915_vm14, %v1916_v14  ;;  %1941 = vmatpush.bf16.xpose.msk.msra.mxu1 %vm1939_vm1, %v1916_v14  ;;  %vm1918_vm14 = vmpackc.low %vm1474_vm9, %vm1472_vm6  ;;  %vm1468_vm6 = vcmp.ge.f32.partialorder %v3728_v60, %v3727_v2  ;;  %vm1470_vm9 = vcmp.ge.f32.partialorder %v3731_v48, %v3730_v44  ;;  %v1970_v58 = vpack.c.bf16 %v1449_v37, %v1448_v29  ;;  %v3744_v14 = vld [vmem:[#allocation73_spill] sm:$0xff]  ;;  %2271 = vrcp.f32 %v3746_v9  ;;  %v3765_v33 = vld [vmem:[#allocation68_spill] sm:$0xff] }
 0x447   : > { %vm1942_vm1 = vmpackc.low %vm1475_vm11, %vm1473_vm10  ;;  %vm1469_vm10 = vcmp.ge.f32.partialorder %v3733_v28, %v3727_v2  ;;  %vm1471_vm11 = vcmp.ge.f32.partialorder %v3734_v11, %v3730_v44  ;;  %v2262_v23 = vpop.eup %2261  ;;  %2273 = vrcp.f32 %v3749_v54  ;;  %v3767_v51 = vld [vmem:[#allocation71_spill] sm:$0xff]  ;;  %v3768_v2 = vld [vmem:[#allocation30_spill] sm:$0xff] }
 0x448   : > { %1965 = vmatpush.bf16.xpose.msk.msra.mxu2 %vm3268_vm2, %v1964_v8  ;;  %1989 = vmatpush.bf16.xpose.msk.msra.mxu3 %vm1987_vm5, %v1964_v8  ;;  %vm3301_vm2 = vmpackc.low %vm1506_vm13, %vm1504_vm12  ;;  %vm1500_vm12 = vcmp.ge.f32.partialorder %v3736_v10, %v3735_v34  ;;  %vm1502_vm13 = vcmp.ge.f32.partialorder %v3738_v52, %v3737_v35  ;;  %v2264_v19 = vpop.eup %2263  ;;  %v1430_v6 = vsel %vm1366_vm3, %v2262_v23, 0.0  ;;  %v3748_v8 = vld [vmem:[#allocation24_spill] sm:$0xff]  ;;  %2275 = vrcp.f32 %v3752_v38  ;;  %v3770_v16 = vld [vmem:[#allocation31_spill] sm:$0xff] }
 0x449   : > { %vm1990_vm5 = vmpackc.low %vm1507_vm0, %vm1505_vm15  ;;  %vm1501_vm15 = vcmp.ge.f32.partialorder %v3739_v21, %v3735_v34  ;;  %vm1503_vm0 = vcmp.ge.f32.partialorder %v3740_v59, %v3737_v35  ;;  %v2266_v57 = vpop.eup %2265  ;;  %v1431_v5 = vsel %vm1367_vm4, %v2264_v19, 0.0  ;;  %vm1364_vm3 = vcmp.lt.f32.partialorder %v3743_v50, 2.0  ;;  %v1900_v44 = vld [vmem:[#allocation3] sm:$0xf]  ;;  %v2009_v48 = vld [vmem:[#allocation3 + $0x4] sm:$0xf0] }
 0x44a   : > { %v2268_v36 = vpop.eup %2267  ;;  %v1446_v56 = vsel %vm1382_vm7, %v2266_v57, 0.0  ;;  %v1925_v25 = vpack.c.bf16 %v1431_v5, %v1430_v6  ;;  %vm1365_vm4 = vcmp.lt.f32.partialorder %v3746_v9, 2.0  ;;  %vm1381_vm7 = vcmp.lt.f32.partialorder %v3752_v38, 2.0  ;;  %v2008_v49 = vld [vmem:[#allocation3 + $0x4] sm:$0xf]  ;;  %v3773_v9 = vld [vmem:[#allocation14_spill] sm:$0xff] }
 0x44b   : > { %v1447_v61 = vsel %vm1383_vm8, %v2268_v36, 0.0  ;;  %v2270_v13 = vpop.eup %2269  ;;  %v1902_v28 = vld [vmem:[#allocation3 + $0x8] sm:$0xf0]  ;;  %v1901_v11 = vor.u32 %v2009_v48, %v1900_v44  ;;  %v1689_v10 = vstv %s1688_s23 }
 0x44c   : > { %v2272_v18 = vpop.eup %2271  ;;  %v1973_v20 = vpack.c.bf16 %v1447_v61, %v1446_v56  ;;  %v1428_v40 = vsel %vm1364_vm3, %v2270_v13, 0.0  ;;  %v1905_v29 = vor.u32 %v2008_v49, %v1902_v28 }
 0x44d   : > { %v2274_v22 = vpop.eup %2273  ;;  %v1429_v30 = vsel %vm1365_vm4, %v2272_v18, 0.0 }
 0x44e   : > { %1920 = vmatpush.bf16.xpose.msk.msra.mxu0 %vm1918_vm14, %v1919_v41  ;;  %1944 = vmatpush.bf16.xpose.msk.msra.mxu1 %vm1942_vm1, %v1919_v41  ;;  %vm1921_vm14 = vmpackc.low %vm1470_vm9, %vm1468_vm6  ;;  %vm1464_vm6 = vcmp.ge.f32.partialorder %v3745_v12, %v3744_v14  ;;  %vm1466_vm9 = vcmp.ge.f32.partialorder %v3748_v8, %v3747_v43  ;;  %v2276_v15 = vpop.eup %2275  ;;  %v3760_v41 = vld [vmem:[#allocation18_spill] sm:$0xff]  ;;  %v1928_v60 = vpack.c.bf16 %v1429_v30, %v1428_v40 }
 0x44f   : > { %vm1945_vm1 = vmpackc.low %vm1471_vm11, %vm1469_vm10  ;;  %vm1465_vm10 = vcmp.ge.f32.partialorder %v3750_v17, %v3744_v14  ;;  %vm1467_vm11 = vcmp.ge.f32.partialorder %v3751_v4, %v3747_v43  ;;  %vm1460_vm8 = vcmp.ge.f32.partialorder %v3760_v41, %v3759_v39  ;;  %v3772_v14 = vld [vmem:[#allocation17_spill] sm:$0xff]  ;;  %v3774_v17 = vld [vmem:[#allocation15_spill] sm:$0xff] }
 0x450   : > { %1968 = vmatpush.bf16.xpose.msk.msra.mxu2 %vm3301_vm2, %v1967_v47  ;;  %1992 = vmatpush.bf16.xpose.msk.msra.mxu3 %vm1990_vm5, %v1967_v47  ;;  %vm3334_vm2 = vmpackc.low %vm1502_vm13, %vm1500_vm12  ;;  %vm1496_vm12 = vcmp.ge.f32.partialorder %v3754_v62, %v3753_v27  ;;  %vm1498_vm13 = vcmp.ge.f32.partialorder %v3756_v26, %v3755_v45  ;;  %v1445_v47 = vsel %vm1381_vm7, %v2276_v15, 0.0 }
 0x451   : > { %vm1993_vm5 = vmpackc.low %vm1503_vm0, %vm1501_vm15  ;;  %vm1497_vm15 = vcmp.ge.f32.partialorder %v3757_v24, %v3753_v27  ;;  %vm1499_vm0 = vcmp.ge.f32.partialorder %v3758_v31, %v3755_v45 }
 0x456   : > { %1923 = vmatpush.bf16.xpose.msk.msra.mxu0 %vm1921_vm14, %v1922_v53  ;;  %1947 = vmatpush.bf16.xpose.msk.msra.mxu1 %vm1945_vm1, %v1922_v53  ;;  %vm1924_vm14 = vmpackc.low %vm1466_vm9, %vm1464_vm6  ;;  %vm1380_vm6 = vcmp.lt.f32.partialorder %v3749_v54, 2.0  ;;  %vm1462_vm9 = vcmp.ge.f32.partialorder %v3762_v3, %v3761_v7  ;;  %v3771_v53 = vld [vmem:[#allocation16_spill] sm:$0xff] }
 0x457   : > { %vm1948_vm1 = vmpackc.low %vm1467_vm11, %vm1465_vm10  ;;  %vm1461_vm10 = vcmp.ge.f32.partialorder %v3763_v55, %v3759_v39  ;;  %vm1463_vm11 = vcmp.ge.f32.partialorder %v3764_v63, %v3761_v7  ;;  %v1444_v0 = vsel %vm1380_vm6, %v2274_v22, 0.0 }
 0x458   : > { %1971 = vmatpush.bf16.xpose.msk.msra.mxu2 %vm3334_vm2, %v1970_v58  ;;  %1995 = vmatpush.bf16.xpose.msk.msra.mxu3 %vm1993_vm5, %v1970_v58  ;;  %vm1972_vm2 = vmpackc.low %vm1498_vm13, %vm1496_vm12  ;;  %vm1492_vm12 = vcmp.ge.f32.partialorder %v3766_v42, %v3765_v33  ;;  %vm1494_vm13 = vcmp.ge.f32.partialorder %v3768_v2, %v3767_v51  ;;  %v1976_v1 = vpack.c.bf16 %v1445_v47, %v1444_v0 }
 0x459   : > { %vm1996_vm5 = vmpackc.low %vm1499_vm0, %vm1497_vm15  ;;  %vm1493_vm15 = vcmp.ge.f32.partialorder %v3769_v46, %v3765_v33  ;;  %vm1495_vm0 = vcmp.ge.f32.partialorder %v3770_v16, %v3767_v51 }
 0x45a   : > { %vm1999_vm3 = vmpackc.low %vm1495_vm0, %vm1493_vm15 }
 0x45e   : > { %1926 = vmatpush.bf16.xpose.msk.msra.mxu0 %vm1924_vm14, %v1925_v25  ;;  %1950 = vmatpush.bf16.xpose.msk.msra.mxu1 %vm1948_vm1, %v1925_v25  ;;  %vm1927_vm14 = vmpackc.low %vm1462_vm9, %vm1460_vm8 }
 0x45f   : > { %vm1951_vm1 = vmpackc.low %vm1463_vm11, %vm1461_vm10 }
 0x460   : > { %1974 = vmatpush.bf16.xpose.msk.msra.mxu2 %vm1972_vm2, %v1973_v20  ;;  %1998 = vmatpush.bf16.xpose.msk.msra.mxu3 %vm1996_vm5, %v1973_v20  ;;  %vm1975_vm2 = vmpackc.low %vm1494_vm13, %vm1492_vm12 }
 0x466   : > { %1929 = vmatpush.bf16.xpose.msk.msra.mxu0 %vm1927_vm14, %v1928_v60  ;;  %1953 = vmatpush.bf16.xpose.msk.msra.mxu1 %vm1951_vm1, %v1928_v60 }
 0x468   : > { %1977 = vmatpush.bf16.xpose.msk.msra.mxu2 %vm1975_vm2, %v1976_v1  ;;  %2001 = vmatpush.bf16.xpose.msk.msra.mxu3 %vm1999_vm3, %v1976_v1 }
 0x46d   : > { %1640 = vmatmul.bf16.vlgmr.msra.gmra.mxu0 %v1901_v11  ;;  %1654 = vmatmul.bf16.vlgmr.msra.gmra.mxu1 %v1905_v29 }
 0x46f   : > { %1668 = vmatmul.bf16.vlgmr.msra.gmra.mxu2 %v1901_v11  ;;  %1682 = vmatmul.bf16.vlgmr.msra.gmra.mxu3 %v1905_v29 }
 0x4ea   : > { %v1641_v37 = vpop.f32.mrf.mxu0  ;;  %v1655_v34 = vpop.f32.mrf.mxu1 }
 0x4eb   : > { %v1656_v35 = vadd.f32 %v1655_v34, %v1641_v37 }
 0x4ed   : > { %v1690_v52 = vmul.f32 %v1689_v10, %v1656_v35 }
 0x4ef   : > { %v1694_v21 = vadd.f32 %v1690_v52, %v3771_v53 }
 0x4f1   : > { %1698 = vst [vmem:[%s3122_s26] sm:$0xff] %v1694_v21 }
 0x4f2   : > { %v1669_v59 = vpop.f32.mrf.mxu2  ;;  %v1683_v23 = vpop.f32.mrf.mxu3 }
 0x4f3   : > { %v1684_v19 = vadd.f32 %v1683_v23, %v1669_v59  ;;  %v1643_v32 = vpop.f32.mrf.mxu0  ;;  %v1657_v58 = vpop.f32.mrf.mxu1 }
 0x4f4   : > { %v1658_v57 = vadd.f32 %v1657_v58, %v1643_v32 }
 0x4f5   : > { %v1691_v50 = vmul.f32 %v1689_v10, %v1684_v19 }
 0x4f6   : > { %v1692_v36 = vmul.f32 %v1689_v10, %v1658_v57 }
 0x4f7   : > { %v1695_v12 = vadd.f32 %v1691_v50, %v3772_v14 }
 0x4f8   : > { %v1696_v6 = vadd.f32 %v1692_v36, %v3773_v9 }
 0x4f9   : > { %1699 = vst [vmem:[%s3122_s26 + $0x8] sm:$0xff] %v1695_v12 }
 0x4fa   : > { %1700 = vst [vmem:[%s3122_s26 + $0x10] sm:$0xff] %v1696_v6  ;;  %v1671_v5 = vpop.f32.mrf.mxu2  ;;  %v1685_v43 = vpop.f32.mrf.mxu3 }
 0x4fb   : > { %v1686_v8 = vadd.f32 %v1685_v43, %v1671_v5 }
 0x4fd   : > { %v1693_v54 = vmul.f32 %v1689_v10, %v1686_v8 }
 0x4ff   : > { %v1697_v4 = vadd.f32 %v1693_v54, %v3774_v17 }
 0x501   : > { %1701 = vst [vmem:[%s3122_s26 + $0x18] sm:$0xff] %v1697_v4 }
 0x502 PF: > { %p1702_p5 = scmp.ge.f32.partialorder %s3117_s25, 2.0 }
 0x503   : > { %v3775_v38 = vld [vmem:[#allocation16_spill] sm:$0xff] (%p1702_p5)  ;;  %v3776_v56 = vld [vmem:[#allocation17_spill] sm:$0xff] (%p1702_p5)  ;;  %v3777_v61 = vld [vmem:[#allocation14_spill] sm:$0xff] (%p1702_p5) }
 0x504   : > { %1705 = sbr.rel (!%p1702_p5) target bundleno = 1289 (0x509), region = 68  ;;  %1706 = vst [vmem:[%s3122_s26] sm:$0xff] (%p1702_p5), %v3775_v38  ;;  %v3778_v27 = vld [vmem:[#allocation15_spill] sm:$0xff] (%p1702_p5) }
 0x505   : > { %1707 = vst [vmem:[%s3122_s26 + $0x8] sm:$0xff] (%p1702_p5), %v3776_v56 }
 0x506   : > { %1708 = vst [vmem:[%s3122_s26 + $0x10] sm:$0xff] (%p1702_p5), %v3777_v61 }
 0x507   : > { %1709 = vst [vmem:[%s3122_s26 + $0x18] sm:$0xff] (%p1702_p5), %v3778_v27 }
 0x509 PF: > { %s2010_s27 = sshll.u32 %s2381_s10, 5  ;;  %s1725_s13 = sshll.u32 %s3122_s26, 4  ;;  %s1726_s13 = int_to_ptr.vmem [resolvable:$true] %s1725_s13 }
 0x50a   : > { %s1724_s17 = scalar_lea.hbm %s3451_s8, %s2010_s27  ;;  %s1711_s24 = scalar_lea.sflag [#allocation8], %s2518_s11 }
 0x50b   : > { %s1727_s15 = sshll.u32 %s1724_s17, 4  ;;  %s2327_s10 = scalar_lea.hbm %s3451_s8, 64  ;;  %s1728_s15 = int_to_ptr.hbm [resolvable:$true] %s1727_s15 }
 0x50c   : > { %s2321_s16 = sshra.s32 %s1728_s15, 4  ;;  %s2322_s16 = int_to_ptr.hbm [resolvable:$true] %s2321_s16 }
 0x50d   : > { %s2323_s14 = scalar_lea.hbm %s2322_s16, 32  ;;  %p2328_p10 = scmp.lt.s32.totalorder %s2322_s16, %s3451_s8 }
 0x50e   : > { %p2324_p6 = scmp.ne.s32.totalorder %s2322_s16, %s2323_s14  ;;  %p2329_p13 = scmp.lt.s32.totalorder %s2327_s10, %s2323_s14 }
 0x510   : > { %p2325_p7 = pnand %p2324_p6, %p2495_p9  ;;  %p2330_p0 = por %p2329_p13, %p2328_p10 }
 0x512   : > { %p2326_p8 = pneg %p2325_p7 }
 0x514   : > { %p2331_p1 = pnand %p2330_p0, %p2326_p8 }
 0x516   : > { %2334 = shalt.err (!%p2331_p1)
}
 0x517   : > { %s2394_s11 = smov 256   ;;  %s2395_s26 = smov 16  }
 0x518   : > { %2017 = dma.vmem_to_hbm [thread:$0]  (%p2495_p9), %s1726_s13, 512, %s1728_s15, %s1711_s24, %s2394_s11, %s2394_s11, %s2395_s26  }
 0x519 PF: > { %s1742_s27 = sand.u32 1, %s2369_s29   ;;  %p2024_p2 = pnand %p1817_p12, %p2502_p11 }
 0x51a   : > { %s1743_s28 = scalar_lea.sflag [#allocation8], %s1742_s27 }
 0x51b   : > { %p2025_p3 = pneg %p2024_p2 }
 0x51d   : > { %2364 = dma.done.wait (%p2025_p3), %s1743_s28, 512  }
 0x51e   : > { %2366 = vsyncadd (%p2025_p3), %s1743_s28, 4294966784  ;;  %s25_s12 = sadd.s32 1, %s2389_s12   ;;  %s3779_s10 = sld [smem:[#allocation12_spill]] }
 0x51f   : > { %p22_p4 = scmp.ge.s32.totalorder %s25_s12, 4   ;;  %s3780_s11 = sld [smem:[#allocation13_spill]] }
 0x520   : > { %s3781_s29 = smov %s2373_s30  ;;  %s3782_s30 = smov %s2377_s9 }
 0x521   : > { %s3783_s9 = smov %s2500_s20  ;;  %24 = sbr.rel (!%p22_p4) target bundleno = 8 (0x8), region = 110 }
 0x526   :  { %1749 = vsyncpa [#allocation7], 1 }
 0x527   :  { %1751 = vsyncpa [#allocation7 + $0x1], 1 }
 0x528   :  { %1752 = vsyncpa [#allocation8], 1 }
 0x529   :  { %1754 = vsyncpa [#allocation8 + $0x1], 1 }

</bundles_post_ra>
